<compile_context>
chip_gen: v7x
topology: tpu7x:2x2x1
jax: 0.10.0
libtpu: 0.0.40
codegen_flags: <defaults>
</compile_context>

<pallas_src>
import jax
import jax.numpy as jnp
import numpy as np
from jax import lax
from jax.experimental import pallas as pl
from jax.experimental.pallas import tpu as pltpu

# ---- sizes (small, TPU-friendly) -------------------------------------------
B, S, H, F = 2, 8, 128, 256          # batch, seq, hidden, FFN hidden
VOCAB, NTYPE = 64, 2                 # vocab / token-type table sizes
NUM_POS, NUM_TAG = 8, 16             # number of POS / NER labels
LN_EPS = 1e-12
N_TOK = B * S                        # flattened token count
LATE_COLS = 2 * H + F                # wo | w1 | packed heads = 512

# the scalar loss is packed into lane H-1 of output row 0; it must not clobber
# a real logit lane.
assert NUM_POS + NUM_TAG < H

# column offsets inside the late weight stack (all multiples of 128 lanes)
WL_O, WL_F1, WL_HD = 0, H, H + F

# rows of the packed bias / LN array [14, 128]
ROW_BQ, ROW_BK, ROW_BV, ROW_BO = 0, 1, 2, 3
ROW_B1A, ROW_B1B, ROW_B2, ROW_BHD = 4, 5, 6, 7
ROW_LN0G, ROW_LN0B = 8, 9
ROW_LN1G, ROW_LN1B = 10, 11
ROW_LN2G, ROW_LN2B = 12, 13
B_ROWS = 14

# aux lane offsets: [0, N_TOK) attention bias, then mask / target_pos / target_tag
AUX_MASK, AUX_TPOS, AUX_TTAG = N_TOK, N_TOK + 1, N_TOK + 2

# block-diagonal attention mask (keeps the B batch rows independent when
# attention runs over the flattened token stream) -- compile-time constant.
_BLOCK_BIAS = np.where(
    (np.arange(N_TOK)[:, None] // S) == (np.arange(N_TOK)[None, :] // S),
    0.0, -1e9).astype(np.float32)


def _layernorm(x, g, b):
    mu = jnp.mean(x, axis=-1, keepdims=True)
    var = jnp.mean((x - mu) ** 2, axis=-1, keepdims=True)
    return (x - mu) * lax.rsqrt(var + LN_EPS) * g + b


# ---------------------------------------------------------------------------
# Single fused kernel: encoder + heads + masked cross-entropy loss
# ---------------------------------------------------------------------------
def fused_kernel(aux_ref, emb_ref, wqkv_ref, b_ref, wlate_hbm, w2_hbm, out_ref,
                 wlate_vmem, w2_vmem, sem):
    bf = lambda t: t.astype(jnp.bfloat16)
    brow = lambda r: b_ref[r:r + 1, :]                               # [1, 128] f32

    # ---- kick off late-weight DMAs so they overlap LN + QKV + attention ----
    cp_late = pltpu.make_async_copy(wlate_hbm, wlate_vmem, sem.at[0])
    cp_w2 = pltpu.make_async_copy(w2_hbm, w2_vmem, sem.at[1])
    cp_late.start()
    cp_w2.start()

    # ---- embeddings layernorm (f32) ----
    x = _layernorm(emb_ref[...], brow(ROW_LN0G), brow(ROW_LN0B))     # [N, H]

    # ---- fused QKV projection: one [N,H]x[H,3H] bf16 MXU pass ----
    qkv = jnp.dot(bf(x), wqkv_ref[...], preferred_element_type=jnp.float32)
    q = qkv[:, 0:H] + brow(ROW_BQ)
    k = qkv[:, H:2 * H] + brow(ROW_BK)
    v = qkv[:, 2 * H:3 * H] + brow(ROW_BV)

    # ---- self-attention over the flattened token stream ----
    # q @ k^T without materializing a transpose (contract RHS dim 1 on MXU).
    sc = lax.dot_general(bf(q), bf(k),
                         dimension_numbers=(((1,), (1,)), ((), ())),
                         preferred_element_type=jnp.float32)         # [N, N]
    # combined (block-diagonal + key-padding) additive bias, precomputed, f32.
    sc = sc * jnp.float32(1.0 / np.sqrt(H)) + aux_ref[:, 0:N_TOK]
    sc = sc - jnp.max(sc, axis=-1, keepdims=True)
    p = jnp.exp(sc)
    p = p * pl.reciprocal(jnp.sum(p, axis=-1, keepdims=True), approx=True)
    ctx = jnp.dot(bf(p), bf(v), preferred_element_type=jnp.float32)  # [N, H]

    # late weights (W_O | W_FFN1 | heads) are first needed here.
    cp_late.wait()
    attn = (jnp.dot(bf(ctx), wlate_vmem[:, WL_O:WL_O + H],
                    preferred_element_type=jnp.float32) + brow(ROW_BO))
    x1 = _layernorm(x + attn, brow(ROW_LN1G), brow(ROW_LN1B))

    # ---- FFN ----
    b1 = jnp.concatenate([brow(ROW_B1A), brow(ROW_B1B)], axis=1)     # [1, F]
    hmid = (jnp.dot(bf(x1), wlate_vmem[:, WL_F1:WL_F1 + F],
                    preferred_element_type=jnp.float32) + b1)
    hmid = jax.nn.gelu(hmid)
    cp_w2.wait()                                                     # FFN2 weight
    ffn = (jnp.dot(bf(hmid), w2_vmem[...],
                   preferred_element_type=jnp.float32) + brow(ROW_B2))
    h_out = _layernorm(x1 + ffn, brow(ROW_LN2G), brow(ROW_LN2B))     # [N, H]

    # TODO(synk): nn.Dropout(0.3) treated as eval-mode identity here.

    # ---- heads: one lane-dense [N,H] x [H,H] bf16 matmul ----
    # columns [0, NUM_POS) = pos logits, [NUM_POS, NUM_POS+NUM_TAG) = tag.
    logits = (jnp.dot(bf(h_out), wlate_vmem[:, WL_HD:WL_HD + H],
                      preferred_element_type=jnp.float32) + brow(ROW_BHD))

    # ---- masked cross-entropy: ONE exp pass over [N, H] (f32) ----
    mask = aux_ref[:, AUX_MASK:AUX_MASK + 1]                         # [N, 1]
    tpos = aux_ref[:, AUX_TPOS:AUX_TPOS + 1].astype(jnp.int32)       # [N, 1]
    ttag = aux_ref[:, AUX_TTAG:AUX_TTAG + 1].astype(jnp.int32)       # [N, 1]
    col = lax.broadcasted_iota(jnp.int32, (N_TOK, H), 1)
    row = lax.broadcasted_iota(jnp.int32, (N_TOK, H), 0)

    pos_valid = col < NUM_POS
    tag_valid = jnp.logical_and(col >= NUM_POS, col < NUM_POS + NUM_TAG)
    any_valid = col < NUM_POS + NUM_TAG
    neg = jnp.float32(-1e30)
    pos_max = jnp.max(jnp.where(pos_valid, logits, neg), axis=-1, keepdims=True)
    tag_max = jnp.max(jnp.where(tag_valid, logits, neg), axis=-1, keepdims=True)
    z = jnp.where(any_valid, logits - jnp.where(pos_valid, pos_max, tag_max), neg)
    ez = jnp.exp(z)                                                  # single EUP pass
    lse_pos = jnp.log(jnp.sum(jnp.where(pos_valid, ez, 0.0), axis=-1, keepdims=True))
    lse_tag = jnp.log(jnp.sum(jnp.where(tag_valid, ez, 0.0), axis=-1, keepdims=True))
    tgt_pos = jnp.sum(jnp.where(col == tpos, z, 0.0), axis=-1, keepdims=True)
    tgt_tag = jnp.sum(jnp.where(col == ttag + NUM_POS, z, 0.0), axis=-1, keepdims=True)
    nll = (lse_pos - tgt_pos) + (lse_tag - tgt_tag)                  # [N, 1]

    cnt = jnp.maximum(jnp.sum(mask, axis=0, keepdims=True), 1.0)     # guard: no /0
    loss = jnp.sum(nll * mask, axis=0, keepdims=True) * (jnp.float32(0.5) / cnt)

    # single lane-dense (unmasked) [N,H] store; the scalar loss lives in the
    # otherwise-padded last lane of row 0 (NUM_POS + NUM_TAG < H asserted).
    out_ref[...] = jnp.where(jnp.logical_and(row == 0, col == H - 1), loss, logits)


def run_fused(aux, emb_flat, pk):
    vmem = pl.BlockSpec(memory_space=pltpu.MemorySpace.VMEM)
    hbm = pl.BlockSpec(memory_space=pl.ANY)
    return pl.pallas_call(
        fused_kernel,
        out_shape=jax.ShapeDtypeStruct((N_TOK, H), jnp.float32),
        in_specs=[vmem, vmem, vmem, vmem, hbm, hbm],
        out_specs=vmem,
        scratch_shapes=[
            pltpu.VMEM((H, LATE_COLS), jnp.bfloat16),   # wo | w1 | head weights
            pltpu.VMEM((F, H), jnp.bfloat16),           # w2
            pltpu.SemaphoreType.DMA((2,)),
        ],
    )(aux, emb_flat, pk["w_qkv"], pk["b_stack"], pk["w_late"], pk["w2"])


# ---------------------------------------------------------------------------
# Parameter init (deterministic, synthetic) + packing into kernel layout
# ---------------------------------------------------------------------------
def init_params(key):
    ks = iter(jax.random.split(key, 32))
    nrm = lambda shape: (0.02 * jax.random.normal(next(ks), shape)).astype(jnp.float32)
    return dict(
        word_emb=nrm((VOCAB, H)), pos_emb=nrm((S, H)), type_emb=nrm((NTYPE, H)),
        ln0g=jnp.ones((1, H), jnp.float32), ln0b=jnp.zeros((1, H), jnp.float32),
        wq=nrm((H, H)), bq=jnp.zeros((1, H), jnp.float32),
        wk=nrm((H, H)), bk=jnp.zeros((1, H), jnp.float32),
        wv=nrm((H, H)), bv=jnp.zeros((1, H), jnp.float32),
        wo=nrm((H, H)), bo=jnp.zeros((1, H), jnp.float32),
        ln1g=jnp.ones((1, H), jnp.float32), ln1b=jnp.zeros((1, H), jnp.float32),
        w1=nrm((H, F)), b1=jnp.zeros((1, F), jnp.float32),
        w2=nrm((F, H)), b2=jnp.zeros((1, H), jnp.float32),
        ln2g=jnp.ones((1, H), jnp.float32), ln2b=jnp.zeros((1, H), jnp.float32),
        wp=nrm((H, NUM_POS)), bp=jnp.zeros((1, NUM_POS), jnp.float32),
        wt=nrm((H, NUM_TAG)), bt=jnp.zeros((1, NUM_TAG), jnp.float32),
    )


def pack_params(p):
    """Pack logical params into the kernel's layout (done once, outside jit)."""
    pad = H - NUM_POS - NUM_TAG
    head_w = jnp.pad(jnp.concatenate([p["wp"], p["wt"]], axis=1), ((0, 0), (0, pad)))
    head_b = jnp.pad(jnp.concatenate([p["bp"], p["bt"]], axis=1), ((0, 0), (0, pad)))
    w_qkv = jnp.concatenate([p["wq"], p["wk"], p["wv"]], axis=1).astype(jnp.bfloat16)
    w_late = jnp.concatenate([p["wo"], p["w1"], head_w], axis=1).astype(jnp.bfloat16)
    w2 = p["w2"].astype(jnp.bfloat16)
    b_stack = jnp.concatenate(
        [p["bq"], p["bk"], p["bv"], p["bo"],
         p["b1"][:, :H], p["b1"][:, H:], p["b2"], head_b,
         p["ln0g"], p["ln0b"], p["ln1g"], p["ln1b"], p["ln2g"], p["ln2b"]],
        axis=0).astype(jnp.float32)                                   # [14, 128]
    assert w_qkv.shape == (H, 3 * H)
    assert w_late.shape == (H, LATE_COLS)
    assert b_stack.shape == (B_ROWS, H)
    return dict(word_emb=p["word_emb"], pos_emb=p["pos_emb"], type_emb=p["type_emb"],
                w_qkv=w_qkv, w_late=w_late, w2=w2, b_stack=b_stack)


# ---------------------------------------------------------------------------
# EntityModel.forward
# ---------------------------------------------------------------------------
@jax.jit
def entity_model_forward(pk, ids, mask, token_type_ids, target_pos, target_tag):
    # ---- glue: embeddings + consolidated aux array (plain JAX) ----
    emb = (pk["word_emb"][ids]
           + pk["pos_emb"][None, :, :]
           + pk["type_emb"][token_type_ids]).astype(jnp.float32)      # [B,S,H]
    emb_flat = emb.reshape(N_TOK, H)

    mask_f = mask.astype(jnp.float32).reshape(N_TOK)
    # combined additive attention bias: static block-diagonal + key padding.
    attn_bias = jnp.asarray(_BLOCK_BIAS) + ((1.0 - mask_f) * -1e9)[None, :]

    aux = jnp.zeros((N_TOK, H), jnp.float32)
    aux = aux.at[:, 0:N_TOK].set(attn_bias)
    aux = aux.at[:, AUX_MASK].set(mask_f)
    aux = aux.at[:, AUX_TPOS].set(target_pos.reshape(N_TOK).astype(jnp.float32))
    aux = aux.at[:, AUX_TTAG].set(target_tag.reshape(N_TOK).astype(jnp.float32))

    # ---- single fused Pallas kernel ----
    out = run_fused(aux, emb_flat, pk)

    pos = out[:, :NUM_POS].reshape(B, S, NUM_POS)
    tag = out[:, NUM_POS:NUM_POS + NUM_TAG].reshape(B, S, NUM_TAG)
    loss = out[0, H - 1]
    return pos, tag, loss


# ---------------------------------------------------------------------------
# Pure-JAX reference (same math, incl. bf16 matmul operands) for sanity check
# ---------------------------------------------------------------------------
def _bdot(a, b):
    return jnp.dot(a.astype(jnp.bfloat16), b.astype(jnp.bfloat16),
                   preferred_element_type=jnp.float32)


def reference_forward(p, ids, mask, token_type_ids, target_pos, target_tag):
    bf = lambda t: t.astype(jnp.bfloat16)
    emb = (p["word_emb"][ids] + p["pos_emb"][None] +
           p["type_emb"][token_type_ids]).astype(jnp.float32)
    bias = ((1.0 - mask.astype(jnp.float32)) * -1e9)[:, None, :]
    x = _layernorm(emb, p["ln0g"], p["ln0b"])
    q = _bdot(x, p["wq"]) + p["bq"]
    k = _bdot(x, p["wk"]) + p["bk"]
    v = _bdot(x, p["wv"]) + p["bv"]
    sc = jnp.einsum("bsh,bth->bst", bf(q), bf(k),
                    preferred_element_type=jnp.float32) / jnp.sqrt(jnp.float32(H)) + bias
    sc = sc - jnp.max(sc, -1, keepdims=True)
    pr = jnp.exp(sc); pr = pr / jnp.sum(pr, -1, keepdims=True)
    ctx = jnp.einsum("bst,bth->bsh", bf(pr), bf(v),
                     preferred_element_type=jnp.float32)
    attn = _bdot(ctx, p["wo"]) + p["bo"]
    x1 = _layernorm(x + attn, p["ln1g"], p["ln1b"])
    ffn = _bdot(jax.nn.gelu(_bdot(x1, p["w1"]) + p["b1"]), p["w2"]) + p["b2"]
    o1 = _layernorm(x1 + ffn, p["ln2g"], p["ln2b"])

    hf = o1.reshape(N_TOK, H)
    pos = _bdot(hf, p["wp"]) + p["bp"]
    tag = _bdot(hf, p["wt"]) + p["bt"]
    mf = mask.astype(jnp.float32).reshape(N_TOK, 1)

    def ce(logits, labels, n):
        z = logits - jnp.max(logits, -1, keepdims=True)
        lp = z - jnp.log(jnp.sum(jnp.exp(z), -1, keepdims=True))
        oh = jax.nn.one_hot(labels.reshape(N_TOK), n)
        nll = -jnp.sum(lp * oh, -1, keepdims=True)
        return jnp.sum(nll * mf) / jnp.sum(mf)

    loss = 0.5 * (ce(pos, target_pos.astype(jnp.int32), NUM_POS) +
                  ce(tag, target_tag.astype(jnp.int32), NUM_TAG))
    return pos.reshape(B, S, NUM_POS), tag.reshape(B, S, NUM_TAG), loss


if __name__ == "__main__":
    root = jax.random.PRNGKey(0)
    k_param, k_ids, k_type, k_pos, k_tag = jax.random.split(root, 5)

    params = init_params(k_param)
    packed = pack_params(params)                 # packed once, outside jit

    ids = jax.random.randint(k_ids, (B, S), 0, VOCAB, dtype=jnp.int32)
    token_type_ids = jax.random.randint(k_type, (B, S), 0, NTYPE, dtype=jnp.int32)
    # attention mask: last two tokens of each sequence padded out
    mask = jnp.concatenate(
        [jnp.ones((B, S - 2), jnp.int32), jnp.zeros((B, 2), jnp.int32)], axis=1)
    target_pos = jax.random.randint(k_pos, (B, S), 0, NUM_POS, dtype=jnp.int32)
    target_tag = jax.random.randint(k_tag, (B, S), 0, NUM_TAG, dtype=jnp.int32)

    pos, tag, loss = entity_model_forward(
        packed, ids, mask, token_type_ids, target_pos, target_tag)
    jax.block_until_ready((pos, tag, loss))

    pos_r, tag_r, loss_r = reference_forward(
        params, ids, mask, token_type_ids, target_pos, target_tag)
    # tolerance covers the EUP approx-reciprocal in the attention softmax and
    # bf16 accumulation-order differences between the fused and reference paths.
    np.testing.assert_allclose(np.asarray(pos), np.asarray(pos_r), rtol=2e-2, atol=1e-2)
    np.testing.assert_allclose(np.asarray(tag), np.asarray(tag_r), rtol=2e-2, atol=1e-2)
    np.testing.assert_allclose(np.asarray(loss), np.asarray(loss_r), rtol=2e-2, atol=1e-2)

    print("KERNEL_OK")
</pallas_src>

<mosaic_0001>
module attributes {stable_mosaic.version = 11 : i64} {
  func.func @fused_kernel(%arg0: memref<16x128xf32, #tpu.memory_space<vmem>>, %arg1: memref<16x128xf32, #tpu.memory_space<vmem>>, %arg2: memref<128x384xbf16, #tpu.memory_space<vmem>>, %arg3: memref<14x128xf32, #tpu.memory_space<vmem>>, %arg4: memref<128x512xbf16, #tpu.memory_space<any>>, %arg5: memref<256x128xbf16, #tpu.memory_space<any>>, %arg6: memref<16x128xf32, #tpu.memory_space<vmem>>, %arg7: memref<128x512xbf16, #tpu.memory_space<vmem>>, %arg8: memref<256x128xbf16, #tpu.memory_space<vmem>>, %arg9: memref<2x!tpu.dma_semaphore, #tpu.memory_space<semaphore_mem>>) attributes {dimension_semantics = [], scalar_prefetch = 0 : i64, scratch_operands = 3 : i64, tpu.core_type = #tpu.core_type<tc>} {
    %c0_i32 = arith.constant 0 : i32
    %0 = tpu.memref_slice %arg9[%c0_i32] : memref<2x!tpu.dma_semaphore, #tpu.memory_space<semaphore_mem>> -> memref<1x!tpu.dma_semaphore, #tpu.memory_space<semaphore_mem>>
    %1 = tpu.memref_squeeze %0 : memref<1x!tpu.dma_semaphore, #tpu.memory_space<semaphore_mem>> -> memref<!tpu.dma_semaphore, #tpu.memory_space<semaphore_mem>>
    tpu.enqueue_dma source(%arg4 : memref<128x512xbf16, #tpu.memory_space<any>>) target(%arg7 : memref<128x512xbf16, #tpu.memory_space<vmem>>) target_semaphore(%1 : memref<!tpu.dma_semaphore, #tpu.memory_space<semaphore_mem>>)
    %c1_i32 = arith.constant 1 : i32
    %2 = tpu.memref_slice %arg9[%c1_i32] : memref<2x!tpu.dma_semaphore, #tpu.memory_space<semaphore_mem>> -> memref<1x!tpu.dma_semaphore, #tpu.memory_space<semaphore_mem>>
    %3 = tpu.memref_squeeze %2 : memref<1x!tpu.dma_semaphore, #tpu.memory_space<semaphore_mem>> -> memref<!tpu.dma_semaphore, #tpu.memory_space<semaphore_mem>>
    tpu.enqueue_dma source(%arg5 : memref<256x128xbf16, #tpu.memory_space<any>>) target(%arg8 : memref<256x128xbf16, #tpu.memory_space<vmem>>) target_semaphore(%3 : memref<!tpu.dma_semaphore, #tpu.memory_space<semaphore_mem>>)
    %c0 = arith.constant 0 : index
    %c0_0 = arith.constant 0 : index
    %4 = vector.load %arg1[%c0, %c0_0] : memref<16x128xf32, #tpu.memory_space<vmem>>, vector<16x128xf32>
    %c8 = arith.constant 8 : index
    %c0_1 = arith.constant 0 : index
    %5 = vector.load %arg3[%c8, %c0_1] : memref<14x128xf32, #tpu.memory_space<vmem>>, vector<1x128xf32>
    %c9 = arith.constant 9 : index
    %c0_2 = arith.constant 0 : index
    %6 = vector.load %arg3[%c9, %c0_2] : memref<14x128xf32, #tpu.memory_space<vmem>>, vector<1x128xf32>
    %cst = arith.constant dense<0.000000e+00> : vector<16xf32>
    %7 = vector.multi_reduction <add>, %4, %cst [1] : vector<16x128xf32> to vector<16xf32>
    %8 = vector.shape_cast %7 : vector<16xf32> to vector<16x1xf32>
    %cst_3 = arith.constant 1.280000e+02 : f32
    %9 = vector.broadcast %cst_3 : f32 to vector<16x1xf32>
    %10 = arith.divf %8, %9 : vector<16x1xf32>
    %11 = vector.broadcast %10 : vector<16x1xf32> to vector<16x128xf32>
    %12 = arith.subf %4, %11 : vector<16x128xf32>
    %13 = arith.mulf %12, %12 : vector<16x128xf32>
    %cst_4 = arith.constant dense<0.000000e+00> : vector<16xf32>
    %14 = vector.multi_reduction <add>, %13, %cst_4 [1] : vector<16x128xf32> to vector<16xf32>
    %15 = vector.shape_cast %14 : vector<16xf32> to vector<16x1xf32>
    %cst_5 = arith.constant 1.280000e+02 : f32
    %16 = vector.broadcast %cst_5 : f32 to vector<16x1xf32>
    %17 = arith.divf %15, %16 : vector<16x1xf32>
    %18 = vector.broadcast %10 : vector<16x1xf32> to vector<16x128xf32>
    %19 = arith.subf %4, %18 : vector<16x128xf32>
    %cst_6 = arith.constant 9.99999996E-13 : f32
    %20 = vector.broadcast %cst_6 : f32 to vector<16x1xf32>
    %21 = arith.addf %17, %20 : vector<16x1xf32>
    %22 = math.rsqrt %21 : vector<16x1xf32>
    %23 = vector.broadcast %22 : vector<16x1xf32> to vector<16x128xf32>
    %24 = arith.mulf %19, %23 : vector<16x128xf32>
    %25 = vector.broadcast %5 : vector<1x128xf32> to vector<16x128xf32>
    %26 = arith.mulf %24, %25 : vector<16x128xf32>
    %27 = vector.broadcast %6 : vector<1x128xf32> to vector<16x128xf32>
    %28 = arith.addf %26, %27 : vector<16x128xf32>
    %29 = arith.truncf %28 : vector<16x128xf32> to vector<16x128xbf16>
    %c0_7 = arith.constant 0 : index
    %c0_8 = arith.constant 0 : index
    %30 = vector.load %arg2[%c0_7, %c0_8] : memref<128x384xbf16, #tpu.memory_space<vmem>>, vector<128x384xbf16>
    %cst_9 = arith.constant dense<0.000000e+00> : vector<16x384xf32>
    %31 = tpu.matmul %29, %30, %cst_9 {dimension_numbers = #tpu.dot_dimension_numbers<[1], [0], [0], [1], [0, 0, 1, 1], [], []>} : vector<16x128xbf16>, vector<128x384xbf16>, vector<16x384xf32> -> vector<16x384xf32>
    %32 = vector.extract_strided_slice %31 {offsets = [0, 0], sizes = [16, 128], strides = [1, 1]} : vector<16x384xf32> to vector<16x128xf32>
    %c0_10 = arith.constant 0 : index
    %c0_11 = arith.constant 0 : index
    %33 = vector.load %arg3[%c0_10, %c0_11] : memref<14x128xf32, #tpu.memory_space<vmem>>, vector<1x128xf32>
    %34 = vector.broadcast %33 : vector<1x128xf32> to vector<16x128xf32>
    %35 = arith.addf %32, %34 : vector<16x128xf32>
    %36 = vector.extract_strided_slice %31 {offsets = [0, 128], sizes = [16, 128], strides = [1, 1]} : vector<16x384xf32> to vector<16x128xf32>
    %c1 = arith.constant 1 : index
    %c0_12 = arith.constant 0 : index
    %37 = vector.load %arg3[%c1, %c0_12] : memref<14x128xf32, #tpu.memory_space<vmem>>, vector<1x128xf32>
    %38 = vector.broadcast %37 : vector<1x128xf32> to vector<16x128xf32>
    %39 = arith.addf %36, %38 : vector<16x128xf32>
    %40 = vector.extract_strided_slice %31 {offsets = [0, 256], sizes = [16, 128], strides = [1, 1]} : vector<16x384xf32> to vector<16x128xf32>
    %c2 = arith.constant 2 : index
    %c0_13 = arith.constant 0 : index
    %41 = vector.load %arg3[%c2, %c0_13] : memref<14x128xf32, #tpu.memory_space<vmem>>, vector<1x128xf32>
    %42 = vector.broadcast %41 : vector<1x128xf32> to vector<16x128xf32>
    %43 = arith.addf %40, %42 : vector<16x128xf32>
    %44 = arith.truncf %35 : vector<16x128xf32> to vector<16x128xbf16>
    %45 = arith.truncf %39 : vector<16x128xf32> to vector<16x128xbf16>
    %cst_14 = arith.constant dense<0.000000e+00> : vector<16x16xf32>
    %46 = tpu.matmul %44, %45, %cst_14 {dimension_numbers = #tpu.dot_dimension_numbers<[1], [1], [0], [0], [0, 0, 1, 0], [], []>} : vector<16x128xbf16>, vector<16x128xbf16>, vector<16x16xf32> -> vector<16x16xf32>
    %cst_15 = arith.constant 0.0883883461 : f32
    %47 = vector.broadcast %cst_15 : f32 to vector<16x16xf32>
    %48 = arith.mulf %46, %47 : vector<16x16xf32>
    %c0_16 = arith.constant 0 : index
    %c0_17 = arith.constant 0 : index
    %49 = vector.load %arg0[%c0_16, %c0_17] : memref<16x128xf32, #tpu.memory_space<vmem>>, vector<16x16xf32>
    %50 = arith.addf %48, %49 : vector<16x16xf32>
    %cst_18 = arith.constant dense<0xFF800000> : vector<16xf32>
    %51 = vector.multi_reduction <maximumf>, %50, %cst_18 [1] : vector<16x16xf32> to vector<16xf32>
    %52 = vector.shape_cast %51 : vector<16xf32> to vector<16x1xf32>
    %53 = vector.broadcast %52 : vector<16x1xf32> to vector<16x16xf32>
    %54 = arith.subf %50, %53 : vector<16x16xf32>
    %55 = math.exp %54 : vector<16x16xf32>
    %cst_19 = arith.constant dense<0.000000e+00> : vector<16xf32>
    %56 = vector.multi_reduction <add>, %55, %cst_19 [1] : vector<16x16xf32> to vector<16xf32>
    %57 = vector.shape_cast %56 : vector<16xf32> to vector<16x1xf32>
    %58 = tpu.reciprocal %57 {approx = true} : vector<16x1xf32> -> vector<16x1xf32>
    %59 = vector.broadcast %58 : vector<16x1xf32> to vector<16x16xf32>
    %60 = arith.mulf %55, %59 : vector<16x16xf32>
    %61 = arith.truncf %60 : vector<16x16xf32> to vector<16x16xbf16>
    %62 = arith.truncf %43 : vector<16x128xf32> to vector<16x128xbf16>
    %cst_20 = arith.constant dense<0.000000e+00> : vector<16x128xf32>
    %63 = tpu.matmul %61, %62, %cst_20 {dimension_numbers = #tpu.dot_dimension_numbers<[1], [0], [0], [1], [0, 0, 1, 1], [], []>} : vector<16x16xbf16>, vector<16x128xbf16>, vector<16x128xf32> -> vector<16x128xf32>
    %c0_i32_21 = arith.constant 0 : i32
    %64 = tpu.memref_slice %arg9[%c0_i32_21] : memref<2x!tpu.dma_semaphore, #tpu.memory_space<semaphore_mem>> -> memref<1x!tpu.dma_semaphore, #tpu.memory_space<semaphore_mem>>
    %65 = tpu.memref_squeeze %64 : memref<1x!tpu.dma_semaphore, #tpu.memory_space<semaphore_mem>> -> memref<!tpu.dma_semaphore, #tpu.memory_space<semaphore_mem>>
    tpu.wait_dma2 semaphore(%65 : memref<!tpu.dma_semaphore, #tpu.memory_space<semaphore_mem>>) src(%arg4 : memref<128x512xbf16, #tpu.memory_space<any>>) dst(%arg7 : memref<128x512xbf16, #tpu.memory_space<vmem>>)
    %66 = arith.truncf %63 : vector<16x128xf32> to vector<16x128xbf16>
    %c0_22 = arith.constant 0 : index
    %c0_23 = arith.constant 0 : index
    %67 = vector.load %arg7[%c0_22, %c0_23] : memref<128x512xbf16, #tpu.memory_space<vmem>>, vector<128x128xbf16>
    %cst_24 = arith.constant dense<0.000000e+00> : vector<16x128xf32>
    %68 = tpu.matmul %66, %67, %cst_24 {dimension_numbers = #tpu.dot_dimension_numbers<[1], [0], [0], [1], [0, 0, 1, 1], [], []>} : vector<16x128xbf16>, vector<128x128xbf16>, vector<16x128xf32> -> vector<16x128xf32>
    %c3 = arith.constant 3 : index
    %c0_25 = arith.constant 0 : index
    %69 = vector.load %arg3[%c3, %c0_25] : memref<14x128xf32, #tpu.memory_space<vmem>>, vector<1x128xf32>
    %70 = vector.broadcast %69 : vector<1x128xf32> to vector<16x128xf32>
    %71 = arith.addf %68, %70 : vector<16x128xf32>
    %72 = arith.addf %28, %71 : vector<16x128xf32>
    %c10 = arith.constant 10 : index
    %c0_26 = arith.constant 0 : index
    %73 = vector.load %arg3[%c10, %c0_26] : memref<14x128xf32, #tpu.memory_space<vmem>>, vector<1x128xf32>
    %c11 = arith.constant 11 : index
    %c0_27 = arith.constant 0 : index
    %74 = vector.load %arg3[%c11, %c0_27] : memref<14x128xf32, #tpu.memory_space<vmem>>, vector<1x128xf32>
    %cst_28 = arith.constant dense<0.000000e+00> : vector<16xf32>
    %75 = vector.multi_reduction <add>, %72, %cst_28 [1] : vector<16x128xf32> to vector<16xf32>
    %76 = vector.shape_cast %75 : vector<16xf32> to vector<16x1xf32>
    %cst_29 = arith.constant 1.280000e+02 : f32
    %77 = vector.broadcast %cst_29 : f32 to vector<16x1xf32>
    %78 = arith.divf %76, %77 : vector<16x1xf32>
    %79 = vector.broadcast %78 : vector<16x1xf32> to vector<16x128xf32>
    %80 = arith.subf %72, %79 : vector<16x128xf32>
    %81 = arith.mulf %80, %80 : vector<16x128xf32>
    %cst_30 = arith.constant dense<0.000000e+00> : vector<16xf32>
    %82 = vector.multi_reduction <add>, %81, %cst_30 [1] : vector<16x128xf32> to vector<16xf32>
    %83 = vector.shape_cast %82 : vector<16xf32> to vector<16x1xf32>
    %cst_31 = arith.constant 1.280000e+02 : f32
    %84 = vector.broadcast %cst_31 : f32 to vector<16x1xf32>
    %85 = arith.divf %83, %84 : vector<16x1xf32>
    %86 = vector.broadcast %78 : vector<16x1xf32> to vector<16x128xf32>
    %87 = arith.subf %72, %86 : vector<16x128xf32>
    %cst_32 = arith.constant 9.99999996E-13 : f32
    %88 = vector.broadcast %cst_32 : f32 to vector<16x1xf32>
    %89 = arith.addf %85, %88 : vector<16x1xf32>
    %90 = math.rsqrt %89 : vector<16x1xf32>
    %91 = vector.broadcast %90 : vector<16x1xf32> to vector<16x128xf32>
    %92 = arith.mulf %87, %91 : vector<16x128xf32>
    %93 = vector.broadcast %73 : vector<1x128xf32> to vector<16x128xf32>
    %94 = arith.mulf %92, %93 : vector<16x128xf32>
    %95 = vector.broadcast %74 : vector<1x128xf32> to vector<16x128xf32>
    %96 = arith.addf %94, %95 : vector<16x128xf32>
    %c4 = arith.constant 4 : index
    %c0_33 = arith.constant 0 : index
    %97 = vector.load %arg3[%c4, %c0_33] : memref<14x128xf32, #tpu.memory_space<vmem>>, vector<1x128xf32>
    %c5 = arith.constant 5 : index
    %c0_34 = arith.constant 0 : index
    %98 = vector.load %arg3[%c5, %c0_34] : memref<14x128xf32, #tpu.memory_space<vmem>>, vector<1x128xf32>
    %99 = tpu.concatenate %97, %98 in 1 : vector<1x128xf32>, vector<1x128xf32> -> vector<1x256xf32>
    %100 = arith.truncf %96 : vector<16x128xf32> to vector<16x128xbf16>
    %c0_35 = arith.constant 0 : index
    %c128 = arith.constant 128 : index
    %101 = vector.load %arg7[%c0_35, %c128] : memref<128x512xbf16, #tpu.memory_space<vmem>>, vector<128x256xbf16>
    %cst_36 = arith.constant dense<0.000000e+00> : vector<16x256xf32>
    %102 = tpu.matmul %100, %101, %cst_36 {dimension_numbers = #tpu.dot_dimension_numbers<[1], [0], [0], [1], [0, 0, 1, 1], [], []>} : vector<16x128xbf16>, vector<128x256xbf16>, vector<16x256xf32> -> vector<16x256xf32>
    %103 = vector.broadcast %99 : vector<1x256xf32> to vector<16x256xf32>
    %104 = arith.addf %102, %103 : vector<16x256xf32>
    %105 = arith.mulf %104, %104 : vector<16x256xf32>
    %106 = arith.mulf %104, %105 : vector<16x256xf32>
    %cst_37 = arith.constant 4.471500e-02 : f32
    %107 = vector.broadcast %cst_37 : f32 to vector<16x256xf32>
    %108 = arith.mulf %107, %106 : vector<16x256xf32>
    %109 = arith.addf %104, %108 : vector<16x256xf32>
    %cst_38 = arith.constant 0.797884583 : f32
    %110 = vector.broadcast %cst_38 : f32 to vector<16x256xf32>
    %111 = arith.mulf %110, %109 : vector<16x256xf32>
    %112 = math.tanh %111 : vector<16x256xf32>
    %cst_39 = arith.constant 1.000000e+00 : f32
    %113 = vector.broadcast %cst_39 : f32 to vector<16x256xf32>
    %114 = arith.addf %113, %112 : vector<16x256xf32>
    %cst_40 = arith.constant 5.000000e-01 : f32
    %115 = vector.broadcast %cst_40 : f32 to vector<16x256xf32>
    %116 = arith.mulf %115, %114 : vector<16x256xf32>
    %117 = arith.mulf %104, %116 : vector<16x256xf32>
    %c1_i32_41 = arith.constant 1 : i32
    %118 = tpu.memref_slice %arg9[%c1_i32_41] : memref<2x!tpu.dma_semaphore, #tpu.memory_space<semaphore_mem>> -> memref<1x!tpu.dma_semaphore, #tpu.memory_space<semaphore_mem>>
    %119 = tpu.memref_squeeze %118 : memref<1x!tpu.dma_semaphore, #tpu.memory_space<semaphore_mem>> -> memref<!tpu.dma_semaphore, #tpu.memory_space<semaphore_mem>>
    tpu.wait_dma2 semaphore(%119 : memref<!tpu.dma_semaphore, #tpu.memory_space<semaphore_mem>>) src(%arg5 : memref<256x128xbf16, #tpu.memory_space<any>>) dst(%arg8 : memref<256x128xbf16, #tpu.memory_space<vmem>>)
    %120 = arith.truncf %117 : vector<16x256xf32> to vector<16x256xbf16>
    %c0_42 = arith.constant 0 : index
    %c0_43 = arith.constant 0 : index
    %121 = vector.load %arg8[%c0_42, %c0_43] : memref<256x128xbf16, #tpu.memory_space<vmem>>, vector<256x128xbf16>
    %cst_44 = arith.constant dense<0.000000e+00> : vector<16x128xf32>
    %122 = tpu.matmul %120, %121, %cst_44 {dimension_numbers = #tpu.dot_dimension_numbers<[1], [0], [0], [1], [0, 0, 1, 1], [], []>} : vector<16x256xbf16>, vector<256x128xbf16>, vector<16x128xf32> -> vector<16x128xf32>
    %c6 = arith.constant 6 : index
    %c0_45 = arith.constant 0 : index
    %123 = vector.load %arg3[%c6, %c0_45] : memref<14x128xf32, #tpu.memory_space<vmem>>, vector<1x128xf32>
    %124 = vector.broadcast %123 : vector<1x128xf32> to vector<16x128xf32>
    %125 = arith.addf %122, %124 : vector<16x128xf32>
    %126 = arith.addf %96, %125 : vector<16x128xf32>
    %c12 = arith.constant 12 : index
    %c0_46 = arith.constant 0 : index
    %127 = vector.load %arg3[%c12, %c0_46] : memref<14x128xf32, #tpu.memory_space<vmem>>, vector<1x128xf32>
    %c13 = arith.constant 13 : index
    %c0_47 = arith.constant 0 : index
    %128 = vector.load %arg3[%c13, %c0_47] : memref<14x128xf32, #tpu.memory_space<vmem>>, vector<1x128xf32>
    %cst_48 = arith.constant dense<0.000000e+00> : vector<16xf32>
    %129 = vector.multi_reduction <add>, %126, %cst_48 [1] : vector<16x128xf32> to vector<16xf32>
    %130 = vector.shape_cast %129 : vector<16xf32> to vector<16x1xf32>
    %cst_49 = arith.constant 1.280000e+02 : f32
    %131 = vector.broadcast %cst_49 : f32 to vector<16x1xf32>
    %132 = arith.divf %130, %131 : vector<16x1xf32>
    %133 = vector.broadcast %132 : vector<16x1xf32> to vector<16x128xf32>
    %134 = arith.subf %126, %133 : vector<16x128xf32>
    %135 = arith.mulf %134, %134 : vector<16x128xf32>
    %cst_50 = arith.constant dense<0.000000e+00> : vector<16xf32>
    %136 = vector.multi_reduction <add>, %135, %cst_50 [1] : vector<16x128xf32> to vector<16xf32>
    %137 = vector.shape_cast %136 : vector<16xf32> to vector<16x1xf32>
    %cst_51 = arith.constant 1.280000e+02 : f32
    %138 = vector.broadcast %cst_51 : f32 to vector<16x1xf32>
    %139 = arith.divf %137, %138 : vector<16x1xf32>
    %140 = vector.broadcast %132 : vector<16x1xf32> to vector<16x128xf32>
    %141 = arith.subf %126, %140 : vector<16x128xf32>
    %cst_52 = arith.constant 9.99999996E-13 : f32
    %142 = vector.broadcast %cst_52 : f32 to vector<16x1xf32>
    %143 = arith.addf %139, %142 : vector<16x1xf32>
    %144 = math.rsqrt %143 : vector<16x1xf32>
    %145 = vector.broadcast %144 : vector<16x1xf32> to vector<16x128xf32>
    %146 = arith.mulf %141, %145 : vector<16x128xf32>
    %147 = vector.broadcast %127 : vector<1x128xf32> to vector<16x128xf32>
    %148 = arith.mulf %146, %147 : vector<16x128xf32>
    %149 = vector.broadcast %128 : vector<1x128xf32> to vector<16x128xf32>
    %150 = arith.addf %148, %149 : vector<16x128xf32>
    %151 = arith.truncf %150 : vector<16x128xf32> to vector<16x128xbf16>
    %c0_53 = arith.constant 0 : index
    %c384 = arith.constant 384 : index
    %152 = vector.load %arg7[%c0_53, %c384] : memref<128x512xbf16, #tpu.memory_space<vmem>>, vector<128x128xbf16>
    %cst_54 = arith.constant dense<0.000000e+00> : vector<16x128xf32>
    %153 = tpu.matmul %151, %152, %cst_54 {dimension_numbers = #tpu.dot_dimension_numbers<[1], [0], [0], [1], [0, 0, 1, 1], [], []>} : vector<16x128xbf16>, vector<128x128xbf16>, vector<16x128xf32> -> vector<16x128xf32>
    %c7 = arith.constant 7 : index
    %c0_55 = arith.constant 0 : index
    %154 = vector.load %arg3[%c7, %c0_55] : memref<14x128xf32, #tpu.memory_space<vmem>>, vector<1x128xf32>
    %155 = vector.broadcast %154 : vector<1x128xf32> to vector<16x128xf32>
    %156 = arith.addf %153, %155 : vector<16x128xf32>
    %c0_56 = arith.constant 0 : index
    %c16 = arith.constant 16 : index
    %157 = vector.load %arg0[%c0_56, %c16] : memref<16x128xf32, #tpu.memory_space<vmem>>, vector<16x1xf32>
    %c0_57 = arith.constant 0 : index
    %c17 = arith.constant 17 : index
    %158 = vector.load %arg0[%c0_57, %c17] : memref<16x128xf32, #tpu.memory_space<vmem>>, vector<16x1xf32>
    %159 = arith.fptosi %158 : vector<16x1xf32> to vector<16x1xi32>
    %c0_58 = arith.constant 0 : index
    %c18 = arith.constant 18 : index
    %160 = vector.load %arg0[%c0_58, %c18] : memref<16x128xf32, #tpu.memory_space<vmem>>, vector<16x1xf32>
    %161 = arith.fptosi %160 : vector<16x1xf32> to vector<16x1xi32>
    %162 = tpu.iota {dimensions = array<i32: 1>} : vector<16x128xi32>
    %163 = tpu.iota {dimensions = array<i32: 0>} : vector<16x128xi32>
    %c8_i32 = arith.constant 8 : i32
    %164 = vector.broadcast %c8_i32 : i32 to vector<16x128xi32>
    %165 = arith.cmpi slt, %162, %164 : vector<16x128xi32>
    %c8_i32_59 = arith.constant 8 : i32
    %166 = vector.broadcast %c8_i32_59 : i32 to vector<16x128xi32>
    %167 = arith.cmpi sge, %162, %166 : vector<16x128xi32>
    %c24_i32 = arith.constant 24 : i32
    %168 = vector.broadcast %c24_i32 : i32 to vector<16x128xi32>
    %169 = arith.cmpi slt, %162, %168 : vector<16x128xi32>
    %170 = arith.andi %167, %169 : vector<16x128xi1>
    %c24_i32_60 = arith.constant 24 : i32
    %171 = vector.broadcast %c24_i32_60 : i32 to vector<16x128xi32>
    %172 = arith.cmpi slt, %162, %171 : vector<16x128xi32>
    %cst_61 = arith.constant -1.000000e+30 : f32
    %173 = vector.broadcast %cst_61 : f32 to vector<16x128xf32>
    %174 = arith.select %165, %156, %173 : vector<16x128xi1>, vector<16x128xf32>
    %cst_62 = arith.constant dense<0xFF800000> : vector<16xf32>
    %175 = vector.multi_reduction <maximumf>, %174, %cst_62 [1] : vector<16x128xf32> to vector<16xf32>
    %176 = vector.shape_cast %175 : vector<16xf32> to vector<16x1xf32>
    %cst_63 = arith.constant -1.000000e+30 : f32
    %177 = vector.broadcast %cst_63 : f32 to vector<16x128xf32>
    %178 = arith.select %170, %156, %177 : vector<16x128xi1>, vector<16x128xf32>
    %cst_64 = arith.constant dense<0xFF800000> : vector<16xf32>
    %179 = vector.multi_reduction <maximumf>, %178, %cst_64 [1] : vector<16x128xf32> to vector<16xf32>
    %180 = vector.shape_cast %179 : vector<16xf32> to vector<16x1xf32>
    %181 = vector.shape_cast %176 : vector<16x1xf32> to vector<16x1xf32>
    %182 = vector.broadcast %181 : vector<16x1xf32> to vector<16x128xf32>
    %183 = vector.shape_cast %180 : vector<16x1xf32> to vector<16x1xf32>
    %184 = vector.broadcast %183 : vector<16x1xf32> to vector<16x128xf32>
    %185 = arith.select %165, %182, %184 : vector<16x128xi1>, vector<16x128xf32>
    %186 = arith.subf %156, %185 : vector<16x128xf32>
    %cst_65 = arith.constant -1.000000e+30 : f32
    %187 = vector.broadcast %cst_65 : f32 to vector<16x128xf32>
    %188 = arith.select %172, %186, %187 : vector<16x128xi1>, vector<16x128xf32>
    %189 = math.exp %188 : vector<16x128xf32>
    %cst_66 = arith.constant 0.000000e+00 : f32
    %190 = vector.broadcast %cst_66 : f32 to vector<16x128xf32>
    %191 = arith.select %165, %189, %190 : vector<16x128xi1>, vector<16x128xf32>
    %cst_67 = arith.constant dense<0.000000e+00> : vector<16xf32>
    %192 = vector.multi_reduction <add>, %191, %cst_67 [1] : vector<16x128xf32> to vector<16xf32>
    %193 = vector.shape_cast %192 : vector<16xf32> to vector<16x1xf32>
    %194 = math.log %193 : vector<16x1xf32>
    %cst_68 = arith.constant 0.000000e+00 : f32
    %195 = vector.broadcast %cst_68 : f32 to vector<16x128xf32>
    %196 = arith.select %170, %189, %195 : vector<16x128xi1>, vector<16x128xf32>
    %cst_69 = arith.constant dense<0.000000e+00> : vector<16xf32>
    %197 = vector.multi_reduction <add>, %196, %cst_69 [1] : vector<16x128xf32> to vector<16xf32>
    %198 = vector.shape_cast %197 : vector<16xf32> to vector<16x1xf32>
    %199 = math.log %198 : vector<16x1xf32>
    %200 = vector.broadcast %159 : vector<16x1xi32> to vector<16x128xi32>
    %201 = arith.cmpi eq, %162, %200 : vector<16x128xi32>
    %cst_70 = arith.constant 0.000000e+00 : f32
    %202 = vector.broadcast %cst_70 : f32 to vector<16x128xf32>
    %203 = arith.select %201, %188, %202 : vector<16x128xi1>, vector<16x128xf32>
    %cst_71 = arith.constant dense<0.000000e+00> : vector<16xf32>
    %204 = vector.multi_reduction <add>, %203, %cst_71 [1] : vector<16x128xf32> to vector<16xf32>
    %205 = vector.shape_cast %204 : vector<16xf32> to vector<16x1xf32>
    %c8_i32_72 = arith.constant 8 : i32
    %206 = vector.broadcast %c8_i32_72 : i32 to vector<16x1xi32>
    %207 = arith.addi %161, %206 : vector<16x1xi32>
    %208 = vector.broadcast %207 : vector<16x1xi32> to vector<16x128xi32>
    %209 = arith.cmpi eq, %162, %208 : vector<16x128xi32>
    %cst_73 = arith.constant 0.000000e+00 : f32
    %210 = vector.broadcast %cst_73 : f32 to vector<16x128xf32>
    %211 = arith.select %209, %188, %210 : vector<16x128xi1>, vector<16x128xf32>
    %cst_74 = arith.constant dense<0.000000e+00> : vector<16xf32>
    %212 = vector.multi_reduction <add>, %211, %cst_74 [1] : vector<16x128xf32> to vector<16xf32>
    %213 = vector.shape_cast %212 : vector<16xf32> to vector<16x1xf32>
    %214 = arith.subf %194, %205 : vector<16x1xf32>
    %215 = arith.subf %199, %213 : vector<16x1xf32>
    %216 = arith.addf %214, %215 : vector<16x1xf32>
    %cst_75 = arith.constant dense<0.000000e+00> : vector<1xf32>
    %217 = vector.multi_reduction <add>, %157, %cst_75 [0] : vector<16x1xf32> to vector<1xf32>
    %218 = vector.shape_cast %217 : vector<1xf32> to vector<1x1xf32>
    %cst_76 = arith.constant 1.000000e+00 : f32
    %219 = vector.broadcast %cst_76 : f32 to vector<1x1xf32>
    %220 = arith.maximumf %218, %219 : vector<1x1xf32>
    %221 = arith.mulf %216, %157 : vector<16x1xf32>
    %cst_77 = arith.constant dense<0.000000e+00> : vector<1xf32>
    %222 = vector.multi_reduction <add>, %221, %cst_77 [0] : vector<16x1xf32> to vector<1xf32>
    %223 = vector.shape_cast %222 : vector<1xf32> to vector<1x1xf32>
    %cst_78 = arith.constant 5.000000e-01 : f32
    %224 = vector.broadcast %cst_78 : f32 to vector<1x1xf32>
    %225 = arith.divf %224, %220 : vector<1x1xf32>
    %226 = arith.mulf %223, %225 : vector<1x1xf32>
    %c0_i32_79 = arith.constant 0 : i32
    %227 = vector.broadcast %c0_i32_79 : i32 to vector<16x128xi32>
    %228 = arith.cmpi eq, %163, %227 : vector<16x128xi32>
    %c127_i32 = arith.constant 127 : i32
    %229 = vector.broadcast %c127_i32 : i32 to vector<16x128xi32>
    %230 = arith.cmpi eq, %162, %229 : vector<16x128xi32>
    %231 = arith.andi %228, %230 : vector<16x128xi1>
    %232 = vector.shape_cast %226 : vector<1x1xf32> to vector<1x1xf32>
    %233 = vector.broadcast %232 : vector<1x1xf32> to vector<16x128xf32>
    %234 = arith.select %231, %233, %156 : vector<16x128xi1>, vector<16x128xf32>
    %c0_80 = arith.constant 0 : index
    %c0_81 = arith.constant 0 : index
    %235 = vector.load %arg6[%c0_80, %c0_81] : memref<16x128xf32, #tpu.memory_space<vmem>>, vector<16x128xf32>
    tpu.vector_store %arg6[%c0_80, %c0_81], %234 {strides = array<i32>} : memref<16x128xf32, #tpu.memory_space<vmem>>, vector<16x128xf32>,
    return
  }
}

</mosaic_0001>

<bundles_post_ra>
// kernel: entity_model_forward.1
= control target key start
LH: loop header
LB: loop body
LE: loop exit
PB: predicated region body
PF: predicated region fallthrough
CT: control target
= control target key end

     0   :  { %s2188_s0 = inlined_call_operand.vmem [shape: f32[16,128], index: 0, kind: input, shape index: {}]   ;;  %s2189_s1 = inlined_call_operand.vmem [shape: f32[16,128], index: 1, kind: input, shape index: {}]   ;;  %s2190_s2 = inlined_call_operand.vmem [shape: bf16[128,384], index: 2, kind: input, shape index: {}]   ;;  %s2191_s3 = inlined_call_operand.vmem [shape: f32[14,128], index: 3, kind: input, shape index: {}]   ;;  %s2192_s4 = inlined_call_operand.vmem [shape: bf16[128,512], index: 4, kind: input, shape index: {}]   ;;  %s2193_s5 = inlined_call_operand.vmem [shape: bf16[256,128], index: 5, kind: input, shape index: {}]   ;;  %s2194_s6 = inlined_call_operand.vmem [shape: f32[16,128], index: 6, kind: output, shape index: {}]  }
   0x1   :  { %v37_v0 = vld [vmem:[%s2192_s4] sm:$0xf]  ;;  %v39_v1 = vld [vmem:[%s2192_s4 + $0x10] sm:$0xf]  ;;  %v41_v2 = vld [vmem:[%s2192_s4 + $0x4] sm:$0xf] }
   0x2   :  { %38 = vst [vmem:[#allocation2] sm:$0xf] %v37_v0  ;;  %40 = vst [vmem:[#allocation2 + $0x4] sm:$0xf] %v39_v1  ;;  %v43_v3 = vld [vmem:[%s2192_s4 + $0x14] sm:$0xf] }
   0x3   :  { %42 = vst [vmem:[#allocation2 + $0x8] sm:$0xf] %v41_v2  ;;  %v45_v4 = vld [vmem:[%s2192_s4 + $0x8] sm:$0xf]  ;;  %v47_v5 = vld [vmem:[%s2192_s4 + $0x18] sm:$0xf] }
   0x4   :  { %44 = vst [vmem:[#allocation2 + $0xc] sm:$0xf] %v43_v3  ;;  %46 = vst [vmem:[#allocation2 + $0x10] sm:$0xf] %v45_v4  ;;  %v49_v6 = vld [vmem:[%s2192_s4 + $0xc] sm:$0xf] }
   0x5   :  { %48 = vst [vmem:[#allocation2 + $0x14] sm:$0xf] %v47_v5  ;;  %v51_v7 = vld [vmem:[%s2192_s4 + $0x1c] sm:$0xff]   ;;  %v55_v8 = vld [vmem:[%s2192_s4 + $0x30] sm:$0xf] }
   0x6   :  { %50 = vst [vmem:[#allocation2 + $0x18] sm:$0xf] %v49_v6  ;;  %52 = vst [vmem:[#allocation2 + $0x1c] sm:$0xff] %v51_v7   ;;  %v57_v9 = vld [vmem:[%s2192_s4 + $0x24] sm:$0xf]  ;;  %v67_v14 = vld [vmem:[%s2192_s4 + $0x3c] sm:$0xff]  }
   0x7   :  { %56 = vst [vmem:[#allocation2 + $0x24] sm:$0xf] %v55_v8  ;;  %v59_v10 = vld [vmem:[%s2192_s4 + $0x34] sm:$0xf]  ;;  %v61_v11 = vld [vmem:[%s2192_s4 + $0x28] sm:$0xf] }
   0x8   :  { %58 = vst [vmem:[#allocation2 + $0x28] sm:$0xf] %v57_v9  ;;  %60 = vst [vmem:[#allocation2 + $0x2c] sm:$0xf] %v59_v10  ;;  %v63_v12 = vld [vmem:[%s2192_s4 + $0x38] sm:$0xf] }
   0x9   :  { %62 = vst [vmem:[#allocation2 + $0x30] sm:$0xf] %v61_v11  ;;  %v65_v13 = vld [vmem:[%s2192_s4 + $0x2c] sm:$0xf]  ;;  %64 = vst [vmem:[#allocation2 + $0x34] sm:$0xf] %v63_v12 }
   0xa   :  { %66 = vst [vmem:[#allocation2 + $0x38] sm:$0xf] %v65_v13  ;;  %68 = vst [vmem:[#allocation2 + $0x3c] sm:$0xff] %v67_v14   ;;  %v71_v15 = vld [vmem:[%s2192_s4 + $0x50] sm:$0xf]  ;;  %v83_v21 = vld [vmem:[%s2192_s4 + $0x5c] sm:$0xff]  }
   0xb   :  { %v73_v16 = vld [vmem:[%s2192_s4 + $0x44] sm:$0xf]  ;;  %v75_v17 = vld [vmem:[%s2192_s4 + $0x54] sm:$0xf]  ;;  %72 = vst [vmem:[#allocation2 + $0x44] sm:$0xf] %v71_v15 }
   0xc   :  { %74 = vst [vmem:[#allocation2 + $0x48] sm:$0xf] %v73_v16  ;;  %76 = vst [vmem:[#allocation2 + $0x4c] sm:$0xf] %v75_v17  ;;  %v77_v18 = vld [vmem:[%s2192_s4 + $0x48] sm:$0xf] }
   0xd   :  { %v79_v19 = vld [vmem:[%s2192_s4 + $0x58] sm:$0xf]  ;;  %v81_v20 = vld [vmem:[%s2192_s4 + $0x4c] sm:$0xf]  ;;  %78 = vst [vmem:[#allocation2 + $0x50] sm:$0xf] %v77_v18 }
   0xe   :  { %80 = vst [vmem:[#allocation2 + $0x54] sm:$0xf] %v79_v19  ;;  %82 = vst [vmem:[#allocation2 + $0x58] sm:$0xf] %v81_v20  ;;  %v87_v22 = vld [vmem:[%s2192_s4 + $0x70] sm:$0xf] }
   0xf   :  { %v89_v23 = vld [vmem:[%s2192_s4 + $0x64] sm:$0xf]  ;;  %84 = vst [vmem:[#allocation2 + $0x5c] sm:$0xff] %v83_v21   ;;  %88 = vst [vmem:[#allocation2 + $0x64] sm:$0xf] %v87_v22  ;;  %v99_v28 = vld [vmem:[%s2192_s4 + $0x7c] sm:$0xff]  }
  0x10   :  { %90 = vst [vmem:[#allocation2 + $0x68] sm:$0xf] %v89_v23  ;;  %v91_v24 = vld [vmem:[%s2192_s4 + $0x74] sm:$0xf]  ;;  %v93_v25 = vld [vmem:[%s2192_s4 + $0x68] sm:$0xf] }
  0x11   :  { %v95_v26 = vld [vmem:[%s2192_s4 + $0x78] sm:$0xf]  ;;  %92 = vst [vmem:[#allocation2 + $0x6c] sm:$0xf] %v91_v24  ;;  %94 = vst [vmem:[#allocation2 + $0x70] sm:$0xf] %v93_v25 }
  0x12   :  { %96 = vst [vmem:[#allocation2 + $0x74] sm:$0xf] %v95_v26  ;;  %v97_v27 = vld [vmem:[%s2192_s4 + $0x6c] sm:$0xf]  ;;  %v103_v29 = vld [vmem:[%s2192_s4 + $0x90] sm:$0xf] }
  0x13   :  { %98 = vst [vmem:[#allocation2 + $0x78] sm:$0xf] %v97_v27  ;;  %100 = vst [vmem:[#allocation2 + $0x7c] sm:$0xff] %v99_v28   ;;  %v105_v30 = vld [vmem:[%s2192_s4 + $0x84] sm:$0xf]  ;;  %v115_v35 = vld [vmem:[%s2192_s4 + $0x9c] sm:$0xff]  }
  0x14   :  { %104 = vst [vmem:[#allocation2 + $0x84] sm:$0xf] %v103_v29  ;;  %v107_v31 = vld [vmem:[%s2192_s4 + $0x94] sm:$0xf]  ;;  %v109_v32 = vld [vmem:[%s2192_s4 + $0x88] sm:$0xf] }
  0x15   :  { %106 = vst [vmem:[#allocation2 + $0x88] sm:$0xf] %v105_v30  ;;  %108 = vst [vmem:[#allocation2 + $0x8c] sm:$0xf] %v107_v31  ;;  %v111_v33 = vld [vmem:[%s2192_s4 + $0x98] sm:$0xf] }
  0x16   :  { %110 = vst [vmem:[#allocation2 + $0x90] sm:$0xf] %v109_v32  ;;  %v113_v34 = vld [vmem:[%s2192_s4 + $0x8c] sm:$0xf]  ;;  %112 = vst [vmem:[#allocation2 + $0x94] sm:$0xf] %v111_v33 }
  0x17   :  { %114 = vst [vmem:[#allocation2 + $0x98] sm:$0xf] %v113_v34  ;;  %116 = vst [vmem:[#allocation2 + $0x9c] sm:$0xff] %v115_v35   ;;  %v119_v36 = vld [vmem:[%s2192_s4 + $0xb0] sm:$0xf]  ;;  %v131_v42 = vld [vmem:[%s2192_s4 + $0xbc] sm:$0xff]  }
  0x18   :  { %v121_v37 = vld [vmem:[%s2192_s4 + $0xa4] sm:$0xf]  ;;  %v123_v38 = vld [vmem:[%s2192_s4 + $0xb4] sm:$0xf]  ;;  %120 = vst [vmem:[#allocation2 + $0xa4] sm:$0xf] %v119_v36 }
  0x19   :  { %122 = vst [vmem:[#allocation2 + $0xa8] sm:$0xf] %v121_v37  ;;  %124 = vst [vmem:[#allocation2 + $0xac] sm:$0xf] %v123_v38  ;;  %v125_v39 = vld [vmem:[%s2192_s4 + $0xa8] sm:$0xf] }
  0x1a   :  { %v127_v40 = vld [vmem:[%s2192_s4 + $0xb8] sm:$0xf]  ;;  %v129_v41 = vld [vmem:[%s2192_s4 + $0xac] sm:$0xf]  ;;  %126 = vst [vmem:[#allocation2 + $0xb0] sm:$0xf] %v125_v39 }
  0x1b   :  { %128 = vst [vmem:[#allocation2 + $0xb4] sm:$0xf] %v127_v40  ;;  %130 = vst [vmem:[#allocation2 + $0xb8] sm:$0xf] %v129_v41  ;;  %v135_v43 = vld [vmem:[%s2192_s4 + $0xd0] sm:$0xf] }
  0x1c   :  { %v137_v44 = vld [vmem:[%s2192_s4 + $0xc4] sm:$0xf]  ;;  %132 = vst [vmem:[#allocation2 + $0xbc] sm:$0xff] %v131_v42   ;;  %136 = vst [vmem:[#allocation2 + $0xc4] sm:$0xf] %v135_v43  ;;  %v147_v49 = vld [vmem:[%s2192_s4 + $0xdc] sm:$0xff]  }
  0x1d   :  { %138 = vst [vmem:[#allocation2 + $0xc8] sm:$0xf] %v137_v44  ;;  %v139_v45 = vld [vmem:[%s2192_s4 + $0xd4] sm:$0xf]  ;;  %v141_v46 = vld [vmem:[%s2192_s4 + $0xc8] sm:$0xf] }
  0x1e   :  { %v143_v47 = vld [vmem:[%s2192_s4 + $0xd8] sm:$0xf]  ;;  %140 = vst [vmem:[#allocation2 + $0xcc] sm:$0xf] %v139_v45  ;;  %142 = vst [vmem:[#allocation2 + $0xd0] sm:$0xf] %v141_v46 }
  0x1f   :  { %144 = vst [vmem:[#allocation2 + $0xd4] sm:$0xf] %v143_v47  ;;  %v145_v48 = vld [vmem:[%s2192_s4 + $0xcc] sm:$0xf]  ;;  %v151_v50 = vld [vmem:[%s2192_s4 + $0xf0] sm:$0xf] }
  0x20   :  { %146 = vst [vmem:[#allocation2 + $0xd8] sm:$0xf] %v145_v48  ;;  %148 = vst [vmem:[#allocation2 + $0xdc] sm:$0xff] %v147_v49   ;;  %v153_v51 = vld [vmem:[%s2192_s4 + $0xe4] sm:$0xf] }
  0x21   :  { %152 = vst [vmem:[#allocation2 + $0xe4] sm:$0xf] %v151_v50  ;;  %v155_v52 = vld [vmem:[%s2192_s4 + $0xf4] sm:$0xf]  ;;  %v157_v53 = vld [vmem:[%s2192_s4 + $0xe8] sm:$0xf] }
  0x22   :  { %154 = vst [vmem:[#allocation2 + $0xe8] sm:$0xf] %v153_v51  ;;  %156 = vst [vmem:[#allocation2 + $0xec] sm:$0xf] %v155_v52  ;;  %v159_v54 = vld [vmem:[%s2192_s4 + $0xf8] sm:$0xf] }
  0x23   :  { %158 = vst [vmem:[#allocation2 + $0xf0] sm:$0xf] %v157_v53  ;;  %v161_v55 = vld [vmem:[%s2192_s4 + $0xec] sm:$0xf]  ;;  %v163_v56 = vld [vmem:[%s2192_s4 + $0xfc] sm:$0xf] }
  0x24   :  { %160 = vst [vmem:[#allocation2 + $0xf4] sm:$0xf] %v159_v54  ;;  %162 = vst [vmem:[#allocation2 + $0xf8] sm:$0xf] %v161_v55 }
  0x25   :  { %164 = vst [vmem:[#allocation2 + $0xfc] sm:$0xf] %v163_v56 }
  0x26   :  { %323 = vsyncadd [#allocation4], 4096  ;;  %v1826_v57 = vld [vmem:[%s2193_s5] sm:$0xff]  ;;  %v1831_v58 = vld [vmem:[%s2193_s5 + $0x8] sm:$0xff] }
  0x27   :  { %v1836_v59 = vld [vmem:[%s2193_s5 + $0x10] sm:$0xff]  ;;  %v1841_v60 = vld [vmem:[%s2193_s5 + $0x18] sm:$0xff]  ;;  %v1846_v61 = vld [vmem:[%s2193_s5 + $0x20] sm:$0xff] }
  0x28   :  { %v1851_v62 = vld [vmem:[%s2193_s5 + $0x28] sm:$0xff]  ;;  %v1856_v63 = vld [vmem:[%s2193_s5 + $0x30] sm:$0xff]  ;;  %v1861_v0 = vld [vmem:[%s2193_s5 + $0x38] sm:$0xff] }
  0x29   :  { %v1866_v1 = vld [vmem:[%s2193_s5 + $0x40] sm:$0xff]  ;;  %v1871_v2 = vld [vmem:[%s2193_s5 + $0x48] sm:$0xff]  ;;  %v1876_v3 = vld [vmem:[%s2193_s5 + $0x50] sm:$0xff] }
  0x2a   :  { %v1881_v4 = vld [vmem:[%s2193_s5 + $0x58] sm:$0xff]  ;;  %v1886_v5 = vld [vmem:[%s2193_s5 + $0x60] sm:$0xff]  ;;  %v1891_v6 = vld [vmem:[%s2193_s5 + $0x68] sm:$0xff] }
  0x2b   :  { %v1896_v7 = vld [vmem:[%s2193_s5 + $0x70] sm:$0xff]  ;;  %v1901_v8 = vld [vmem:[%s2193_s5 + $0x78] sm:$0xff]  ;;  %v397_v9 = vld [vmem:[%s2189_s1] sm:$0xff] }
  0x2c   :  { %v398_v10 = vld [vmem:[%s2189_s1 + $0x8] sm:$0xff] }
  0x2d   :  { %396 = vsyncadd [#allocation4 + $0x1], 2048  ;;  %401 = vadd.xlane.f32.xlu0 %v397_v9  ;;  %v1529_v11 = vld [vmem:[%s2190_s2 + $0x4] ss:$12 sps:$4 sm:$0xff]   ;;  %v1531_v12 = vld [vmem:[%s2190_s2] ss:$12 sps:$4 sm:$0xff]  }
  0x2e   :  { %v1611_v13 = vmov 0.0   ;;  %v1532_v14 = vld [vmem:[%s2190_s2 + $0x8] ss:$12 sps:$4 sm:$0xff]   ;;  %597 = vmatprep.subr.bf16.mxu0 %v1529_v11  ;;  %v1535_v24 = vld [vmem:[%s2190_s2 + $0x18] ss:$12 sps:$4 sm:$0xff]   ;;  %v1612_v39 = vmov 0  }
  0x2f   :  { %1447 = vmatprep.subr.bf16.mxu1 %v1611_v13  ;;  %v1533_v15 = vld [vmem:[%s2190_s2 + $0x1c] ss:$12 sps:$4 sm:$0xff]   ;;  %598 = vmatpush1.bf16.msra.mxu0 %v1531_v12  ;;  %v1536_v25 = vld [vmem:[%s2190_s2 + $0x20] ss:$12 sps:$4 sm:$0xff]   ;;  %v1540_v28 = vld [vmem:[%s2190_s2 + $0x38] ss:$12 sps:$4 sm:$0xff]  }
  0x30   :  { %1448 = vmatpush3.bf16.msra.mxu1 %v1532_v14  ;;  %599 = vmatprep.subr.bf16.mxu0 %v1533_v15  ;;  %v1537_v26 = vld [vmem:[%s2190_s2 + $0x34] ss:$12 sps:$4 sm:$0xff]   ;;  %v1539_v27 = vld [vmem:[%s2190_s2 + $0x30] ss:$12 sps:$4 sm:$0xff]   ;;  %v1541_v29 = vld [vmem:[%s2190_s2 + $0x4c] ss:$12 sps:$4 sm:$0xff]  }
  0x31   :  { %403 = vadd.xlane.f32.xlu0 %v398_v10  ;;  %1449 = vmatprep.subr.bf16.mxu1 %v1611_v13  ;;  %v1543_v30 = vld [vmem:[%s2190_s2 + $0x48] ss:$12 sps:$4 sm:$0xff]   ;;  %v1544_v31 = vld [vmem:[%s2190_s2 + $0x50] ss:$12 sps:$4 sm:$0xff]   ;;  %v1547_v33 = vld [vmem:[%s2190_s2 + $0x60] ss:$12 sps:$4 sm:$0xff]  }
  0x32   :  { %v1545_v32 = vld [vmem:[%s2190_s2 + $0x64] ss:$12 sps:$4 sm:$0xff]   ;;  %v1548_v34 = vld [vmem:[%s2190_s2 + $0x68] ss:$12 sps:$4 sm:$0xff]   ;;  %v1552_v37 = vld [vmem:[%s2190_s2 + $0x80] ss:$12 sps:$4 sm:$0xff]   ;;  %629 = vmatprep.mubr.bf16.mxu0 %v1612_v39 }
  0x33   :  { %600 = vmatpush1.bf16.msra.mxu0 %v1535_v24  ;;  %v1549_v35 = vld [vmem:[%s2190_s2 + $0x7c] ss:$12 sps:$4 sm:$0xff]   ;;  %v1551_v36 = vld [vmem:[%s2190_s2 + $0x78] ss:$12 sps:$4 sm:$0xff]   ;;  %v1553_v38 = vld [vmem:[%s2190_s2 + $0x94] ss:$12 sps:$4 sm:$0xff]  }
  0x34   :  { %1450 = vmatpush3.bf16.msra.mxu1 %v1536_v25  ;;  %601 = vmatprep.subr.bf16.mxu0 %v1537_v26  ;;  %vm1613_vm0 = vmmov 0   ;;  %v1555_v40 = vld [vmem:[%s2190_s2 + $0x90] ss:$12 sps:$4 sm:$0xff]   ;;  %v1556_v41 = vld [vmem:[%s2190_s2 + $0x98] ss:$12 sps:$4 sm:$0xff]   ;;  %vm751_vm1 = vcmask 130048  }
  0x35   :  { %1451 = vmatprep.subr.bf16.mxu1 %v1611_v13  ;;  %1463 = vmatprep.mubr.msk.bf16.mxu1 %vm1613_vm0, %v1611_v13  ;;  %v1557_v42 = vld [vmem:[%s2190_s2 + $0xac] ss:$12 sps:$4 sm:$0xff]   ;;  %v1559_v43 = vld [vmem:[%s2190_s2 + $0xa8] ss:$12 sps:$4 sm:$0xff]   ;;  %v1560_v44 = vld [vmem:[%s2190_s2 + $0xb0] ss:$12 sps:$4 sm:$0xff]  }
  0x36   :  { %v1353_v53 = vld [vmem:[%s2191_s3 + $0x8] ss:$0 sm:$0xff] }
  0x37   :  { %602 = vmatpush1.bf16.msra.mxu0 %v1539_v27 }
  0x38   :  { %1452 = vmatpush3.bf16.msra.mxu1 %v1540_v28  ;;  %603 = vmatprep.subr.bf16.mxu0 %v1541_v29 }
  0x39   :  { %1453 = vmatprep.subr.bf16.mxu1 %v1611_v13 }
  0x3b   :  { %604 = vmatpush1.bf16.msra.mxu0 %v1543_v30 }
  0x3c   :  { %1454 = vmatpush3.bf16.msra.mxu1 %v1544_v31  ;;  %605 = vmatprep.subr.bf16.mxu0 %v1545_v32 }
  0x3d   :  { %1455 = vmatprep.subr.bf16.mxu1 %v1611_v13 }
  0x3f   :  { %606 = vmatpush1.bf16.msra.mxu0 %v1547_v33 }
  0x40   :  { %1456 = vmatpush3.bf16.msra.mxu1 %v1548_v34  ;;  %607 = vmatprep.subr.bf16.mxu0 %v1549_v35 }
  0x41   :  { %1457 = vmatprep.subr.bf16.mxu1 %v1611_v13 }
  0x43   :  { %608 = vmatpush1.bf16.msra.mxu0 %v1551_v36  ;;  %v747_v36 = vld [vmem:[%s2188_s0] sm:$0xff] }
  0x44   :  { %1458 = vmatpush3.bf16.msra.mxu1 %v1552_v37  ;;  %609 = vmatprep.subr.bf16.mxu0 %v1553_v38 }
  0x45   :  { %1459 = vmatprep.subr.bf16.mxu1 %v1611_v13 }
  0x47   :  { %610 = vmatpush1.bf16.msra.mxu0 %v1555_v40 }
  0x48   :  { %1460 = vmatpush3.bf16.msra.mxu1 %v1556_v41  ;;  %611 = vmatprep.subr.bf16.mxu0 %v1557_v42  ;;  %v748_v41 = vld [vmem:[%s2188_s0 + $0x8] sm:$0xff] }
  0x49   :  { %1461 = vmatprep.subr.bf16.mxu1 %v1611_v13 }
  0x4b   :  { %612 = vmatpush1.bf16.msra.mxu0 %v1559_v43 }
  0x4c   :  { %1462 = vmatpush3.bf16.msra.mxu1 %v1560_v44  ;;  %1467 = vmatprep.subr.bf16.mxu0 %v1611_v13 }
  0x4d   :  { %1473 = vmatprep.subr.bf16.mxu1 %v1611_v13 }
  0xba   :  { %v402_v16 = vpop.xlane.xlu0 %401 }
  0xbb   :  { %v406_v17 = vmul.f32 0.0078125, %v402_v16  ;;  %v1379_v16 = vld [vmem:[%s2191_s3] ss:$0 sm:$0xff] }
  0xbd   :  { %v1923_v18 = vsub.f32 %v397_v9, %v406_v17  ;;  %v1354_v9 = vld [vmem:[%s2191_s3 + $0x9] ss:$0 sm:$0xff] }
  0xbe   :  { %v404_v19 = vpop.xlane.xlu0 %403 }
  0xbf   :  { %v407_v20 = vmul.f32 0.0078125, %v404_v19  ;;  %v410_v21 = vmul.f32 %v1923_v18, %v1923_v18 }
  0xc1   :  { %v1927_v22 = vsub.f32 %v398_v10, %v407_v20  ;;  %412 = vadd.xlane.f32.xlu1 %v410_v21  ;;  %v1380_v20 = vld [vmem:[%s2191_s3 + $0x1] ss:$0 sm:$0xff] }
  0xc3   :  { %v411_v23 = vmul.f32 %v1927_v22, %v1927_v22 }
  0xc5   :  { %414 = vadd.xlane.f32.xlu1 %v411_v23 }
 0x14e   :  { %v413_v45 = vpop.xlane.xlu1 %412 }
 0x14f   :  { %v416_v46 = vmul.f32 0.0078125, %v413_v45 }
 0x151   :  { %v418_v47 = vadd.f32 1e-12, %v416_v46 }
 0x152   :  { %v415_v48 = vpop.xlane.xlu1 %414 }
 0x153   :  { %1561 = vrsqrt.f32 %v418_v47  ;;  %v417_v49 = vmul.f32 0.0078125, %v415_v48 }
 0x155   :  { %v419_v50 = vadd.f32 1e-12, %v417_v49 }
 0x157   :  { %1563 = vrsqrt.f32 %v419_v50 }
 0x15d   :  { %v1562_v51 = vpop.eup %1561 }
 0x15e   :  { %v422_v52 = vmul.f32 %v1562_v51, %v1923_v18  ;;  %v1381_v18 = vld [vmem:[%s2191_s3 + $0x2] ss:$0 sm:$0xff] }
 0x160   :  { %v428_v56 = vmul.f32 %v1353_v53, %v422_v52 }
 0x161   :  { %v1564_v54 = vpop.eup %1563 }
 0x162   :  { %v423_v55 = vmul.f32 %v1564_v54, %v1927_v22  ;;  %v2010_v11 = vadd.f32 %v1354_v9, %v428_v56 }
 0x164   :  { %v429_v10 = vmul.f32 %v1353_v53, %v423_v55 }
 0x166   :  { %v2012_v12 = vadd.f32 %v1354_v9, %v429_v10 }
 0x168   :  { %v436_v14 = vpack.c.bf16 %v2012_v12, %v2010_v11 }
 0x16a   :  { %630 = vmatmul.mubr.bf16.vlgmr.msra.gmra.mrb[0].mxu0 %v436_v14  ;;  %1464 = vmatmul.mubr.bf16.vlgmr.msra.gmra.mrb[0].mxu1 %v436_v14 }
 0x16b   :  { %1469 = vmatprep.mubr.msk.bf16.mxu0 %vm1613_vm0, %v1611_v13  ;;  %1475 = vmatprep.mubr.msk.bf16.mxu1 %vm1613_vm0, %v1611_v13 }
 0x23d   :  { %v631_v15 = vpop.f32.mrb[0].mxu0  ;;  %v674_v17 = vpop.f32.mrb[0].mxu1 }
 0x23e   :  { %v633_v19 = vpop.f32.mrb[1].mxu0  ;;  %v1465_v21 = vpop.f32.mrb[1].mxu1  ;;  %v686_v24 = vadd.f32 %v1379_v16, %v631_v15  ;;  %v700_v25 = vadd.f32 %v1381_v18, %v674_v17 }
 0x23f   :  { %v635_v22 = vpop.f32.mrb[2].mxu0  ;;  %v677_v23 = vpop.f32.mrb[2].mxu1  ;;  %v693_v30 = vadd.f32 %v1380_v20, %v633_v19 }
 0x240   :  { %v687_v26 = vadd.f32 %v1379_v16, %v635_v22  ;;  %v701_v27 = vadd.f32 %v1381_v18, %v677_v23  ;;  %v637_v28 = vpop.f32.mrb[3].mxu0  ;;  %v1466_v29 = vpop.f32.mrb[3].mxu1 }
 0x241   :  { %v694_v31 = vadd.f32 %v1380_v20, %v637_v28 }
 0x242   :  { %v702_v32 = vpack.c.bf16 %v687_v26, %v686_v24  ;;  %v775_v33 = vpack.c.bf16 %v701_v27, %v700_v25 }
 0x243   :  { %v703_v34 = vpack.c.bf16 %v694_v31, %v693_v30 }
 0x244   :  { %1474 = vmatpush3.bf16.msra.mxu1 %v775_v33 }
 0x245   :  { %1468 = vmatpush3.bf16.xpose.msra.mxu0 %v703_v34 }
 0x24c   :  { %1470 = vmatmul.mubr.bf16.vlgmr.msra.gmra.mrb[4].mxu0 %v702_v32 }
 0x31f   :  { %v738_v35 = vpop.f32.mrb[4].mxu0 }
 0x320   :  { %v745_v37 = vmul.f32 0.088388346, %v738_v35  ;;  %v1471_v38 = vpop.f32.mrb[5].mxu0 }
 0x321   :  { %v741_v40 = vpop.f32.mrb[6].mxu0 }
 0x322   :  { %v746_v42 = vmul.f32 0.088388346, %v741_v40  ;;  %v1472_v43 = vpop.f32.mrb[7].mxu0  ;;  %v749_v44 = vadd.f32 %v747_v36, %v745_v37 }
 0x324   :  { %v752_v45 = vsel %vm751_vm1, %v749_v44, -inf  ;;  %v750_v46 = vadd.f32 %v748_v41, %v746_v42 }
 0x325   :  { %753 = vmax.xlane.f32.xlu0 %v752_v45 }
 0x326   :  { %v755_v47 = vsel %vm751_vm1, %v750_v46, -inf }
 0x327   :  { %756 = vmax.xlane.f32.xlu1 %v755_v47 }
 0x3b2   :  { %v754_v48 = vpop.xlane.xlu0 %753 }
 0x3b3   :  { %v758_v49 = vsub.f32 %v749_v44, %v754_v48 }
 0x3b4   :  { %v757_v50 = vpop.xlane.xlu1 %756 }
 0x3b5   :  { %v760_v51 = vmul.f32 1.442695, %v758_v49  ;;  %v759_v52 = vsub.f32 %v750_v46, %v757_v50 }
 0x3b7   :  { %1565 = vpow2.f32 %v760_v51  ;;  %v762_v53 = vmul.f32 1.442695, %v759_v52 }
 0x3b9   :  { %1567 = vpow2.f32 %v762_v53 }
 0x3c1   :  { %v1566_v54 = vpop.eup %1565 }
 0x3c2   :  { %v764_v55 = vsel %vm751_vm1, %v1566_v54, 0.0 }
 0x3c3   :  { %v1568_v56 = vpop.eup %1567  ;;  %765 = vadd.xlane.f32.xlu0 %v764_v55 }
 0x3c4   :  { %v767_v9 = vsel %vm751_vm1, %v1568_v56, 0.0 }
 0x3c5   :  { %768 = vadd.xlane.f32.xlu1 %v767_v9 }
 0x450   :  { %v766_v10 = vpop.xlane.xlu0 %765 }
 0x451   :  { %1569 = vrcp.f32 %v766_v10 }
 0x452   :  { %v769_v14 = vpop.xlane.xlu1 %768 }
 0x453   :  { %1571 = vrcp.f32 %v769_v14 }
 0x45b   :  { %v1570_v15 = vpop.eup %1569 }
 0x45c   :  { %v772_v17 = vmul.f32 %v1570_v15, %v1566_v54 }
 0x45d   :  { %v1572_v16 = vpop.eup %1571 }
 0x45e   :  { %v773_v18 = vmul.f32 %v1572_v16, %v1568_v56 }
 0x460   :  { %v774_v19 = vpack.c.bf16 %v773_v18, %v772_v17 }
 0x462   :  { %1476 = vmatmul.mubr.msk.bf16.vlgmr.msra.gmra.mrb[4].mxu1 %vm751_vm1, %v774_v19 }
 0x535   :  { %v813_v20 = vpop.f32.mrb[4].mxu1 }
 0x536   :  { %v1477_v21 = vpop.f32.mrb[5].mxu1 }
 0x537   :  { %v816_v22 = vpop.f32.mrb[6].mxu1 }
 0x538   :  { %v1478_v23 = vpop.f32.mrb[7].mxu1 }
 0x539   :  { %1607 = dma.done.wait [#allocation4], 4096 }
 0x53a   :  { %1608 = vsyncadd [#allocation4], 4294963200  ;;  %1479 = vmatprep.subr.bf16.mxu0 %v1611_v13  ;;  %1495 = vmatprep.mubr.msk.bf16.mxu0 %vm1613_vm0, %v1611_v13  ;;  %v825_v24 = vld [vmem:[#allocation2] sm:$0xff]  ;;  %v824_v31 = vpack.c.bf16 %v816_v22, %v813_v20  ;;  %v921_v42 = vld [vmem:[#allocation2 + $0x10] sm:$0xff] }
 0x53b   :  { %976 = vmatprep.mubr.bf16.mxu1 %v1612_v39  ;;  %1480 = vmatpush3.bf16.msra.mxu0 %v825_v24  ;;  %v826_v25 = vld [vmem:[#allocation2 + $0x20] sm:$0xff]  ;;  %v920_v43 = vld [vmem:[#allocation2 + $0x8] sm:$0xff]  ;;  %v923_v44 = vld [vmem:[#allocation2 + $0x30] sm:$0xff] }
 0x53c   :  { %1481 = vmatprep.subr.bf16.mxu0 %v1611_v13  ;;  %v827_v26 = vld [vmem:[#allocation2 + $0x40] sm:$0xff]  ;;  %944 = vmatprep.subr.bf16.mxu1 %v921_v42  ;;  %v922_v52 = vld [vmem:[#allocation2 + $0x28] sm:$0xff]  ;;  %v927_v54 = vld [vmem:[#allocation2 + $0x70] sm:$0xff] }
 0x53d   :  { %v828_v27 = vld [vmem:[#allocation2 + $0x60] sm:$0xff]  ;;  %945 = vmatpush1.bf16.msra.mxu1 %v920_v43  ;;  %v924_v53 = vld [vmem:[#allocation2 + $0x48] sm:$0xff]  ;;  %v929_v56 = vld [vmem:[#allocation2 + $0x90] sm:$0xff] }
 0x53e   :  { %v829_v28 = vld [vmem:[#allocation2 + $0x80] sm:$0xff]  ;;  %946 = vmatprep.subr.bf16.mxu1 %v923_v44  ;;  %v926_v55 = vld [vmem:[#allocation2 + $0x68] sm:$0xff]  ;;  %v931_v10 = vld [vmem:[#allocation2 + $0xb0] sm:$0xff] }
 0x53f   :  { %1482 = vmatpush3.bf16.msra.mxu0 %v826_v25  ;;  %v830_v39 = vld [vmem:[#allocation2 + $0xa0] sm:$0xff]  ;;  %v928_v9 = vld [vmem:[#allocation2 + $0x88] sm:$0xff]  ;;  %v933_v15 = vld [vmem:[#allocation2 + $0xd0] sm:$0xff] }
 0x540   :  { %1483 = vmatprep.subr.bf16.mxu0 %v1611_v13  ;;  %v831_v29 = vld [vmem:[#allocation2 + $0xc0] sm:$0xff]  ;;  %v930_v14 = vld [vmem:[#allocation2 + $0xa8] sm:$0xff]  ;;  %v935_v17 = vld [vmem:[#allocation2 + $0xf0] sm:$0xff] }
 0x541   :  { %v832_v30 = vld [vmem:[#allocation2 + $0xe0] sm:$0xff]  ;;  %947 = vmatpush1.bf16.msra.mxu1 %v922_v52  ;;  %v932_v16 = vld [vmem:[#allocation2 + $0xc8] sm:$0xff] }
 0x542   :  { %v1383_v32 = vld [vmem:[%s2191_s3 + $0x3] ss:$0 sm:$0xff]  ;;  %v934_v18 = vld [vmem:[#allocation2 + $0xe8] sm:$0xff] }
 0x543   :  { %1484 = vmatpush3.bf16.msra.mxu0 %v827_v26 }
 0x544   :  { %1485 = vmatprep.subr.bf16.mxu0 %v1611_v13 }
 0x547   :  { %1486 = vmatpush3.bf16.msra.mxu0 %v828_v27  ;;  %v1384_v27 = vld [vmem:[%s2191_s3 + $0xa] ss:$0 sm:$0xff] }
 0x548   :  { %1487 = vmatprep.subr.bf16.mxu0 %v1611_v13 }
 0x54b   :  { %1488 = vmatpush3.bf16.msra.mxu0 %v829_v28 }
 0x54c   :  { %1489 = vmatprep.subr.bf16.mxu0 %v1611_v13 }
 0x54f   :  { %1490 = vmatpush3.bf16.msra.mxu0 %v830_v39 }
 0x550   :  { %1491 = vmatprep.subr.bf16.mxu0 %v1611_v13 }
 0x553   :  { %1492 = vmatpush3.bf16.msra.mxu0 %v831_v29 }
 0x554   :  { %1493 = vmatprep.subr.bf16.mxu0 %v1611_v13 }
 0x557   :  { %1494 = vmatpush3.bf16.msra.mxu0 %v832_v30  ;;  %v1385_v30 = vld [vmem:[%s2191_s3 + $0xb] ss:$0 sm:$0xff] }
 0x558   :  { %1416 = vmatprep.subr.bf16.mxu0 %v1866_v1 }
 0x55a   :  { %1496 = vmatmul.mubr.bf16.vlgmr.msra.gmra.mrb[8].mxu0 %v824_v31 }
 0x62d   :  { %v872_v33 = vpop.f32.mrb[8].mxu0 }
 0x62e   :  { %v873_v34 = vadd.f32 %v1383_v32, %v872_v33  ;;  %v1497_v35 = vpop.f32.mrb[9].mxu0 }
 0x62f   :  { %v875_v36 = vpop.f32.mrb[10].mxu0  ;;  %v1386_v35 = vld [vmem:[%s2191_s3 + $0x4] ss:$0 sm:$0xff] }
 0x630   :  { %v879_v37 = vadd.f32 %v873_v34, %v2010_v11  ;;  %v876_v38 = vadd.f32 %v1383_v32, %v875_v36  ;;  %v1498_v40 = vpop.f32.mrb[11].mxu0  ;;  %v1387_v36 = vld [vmem:[%s2191_s3 + $0x5] ss:$0 sm:$0xff] }
 0x632   :  { %883 = vadd.xlane.f32.xlu0 %v879_v37  ;;  %v880_v41 = vadd.f32 %v876_v38, %v2012_v12  ;;  %v925_v12 = vld [vmem:[#allocation2 + $0x50] sm:$0xff] }
 0x633   :  { %948 = vmatprep.subr.bf16.mxu1 %v925_v12 }
 0x634   :  { %949 = vmatpush1.bf16.msra.mxu1 %v924_v53 }
 0x635   :  { %950 = vmatprep.subr.bf16.mxu1 %v927_v54 }
 0x636   :  { %885 = vadd.xlane.f32.xlu0 %v880_v41 }
 0x638   :  { %951 = vmatpush1.bf16.msra.mxu1 %v926_v55 }
 0x639   :  { %952 = vmatprep.subr.bf16.mxu1 %v929_v56 }
 0x63c   :  { %953 = vmatpush1.bf16.msra.mxu1 %v928_v9 }
 0x63d   :  { %954 = vmatprep.subr.bf16.mxu1 %v931_v10 }
 0x640   :  { %955 = vmatpush1.bf16.msra.mxu1 %v930_v14 }
 0x641   :  { %956 = vmatprep.subr.bf16.mxu1 %v933_v15 }
 0x644   :  { %957 = vmatpush1.bf16.msra.mxu1 %v932_v16 }
 0x645   :  { %958 = vmatprep.subr.bf16.mxu1 %v935_v17 }
 0x648   :  { %959 = vmatpush1.bf16.msra.mxu1 %v934_v18 }
 0x6bf   :  { %v884_v45 = vpop.xlane.xlu0 %883 }
 0x6c0   :  { %v887_v46 = vmul.f32 0.0078125, %v884_v45 }
 0x6c2   :  { %v889_v47 = vsub.f32 %v879_v37, %v887_v46 }
 0x6c3   :  { %v886_v48 = vpop.xlane.xlu0 %885 }
 0x6c4   :  { %v888_v49 = vmul.f32 0.0078125, %v886_v48  ;;  %v891_v50 = vmul.f32 %v889_v47, %v889_v47 }
 0x6c6   :  { %v890_v51 = vsub.f32 %v880_v41, %v888_v49  ;;  %893 = vadd.xlane.f32.xlu1 %v891_v50 }
 0x6c8   :  { %v892_v11 = vmul.f32 %v890_v51, %v890_v51 }
 0x6ca   :  { %895 = vadd.xlane.f32.xlu1 %v892_v11 }
 0x753   :  { %v894_v19 = vpop.xlane.xlu1 %893 }
 0x754   :  { %v897_v20 = vmul.f32 0.0078125, %v894_v19 }
 0x756   :  { %v899_v21 = vadd.f32 1e-12, %v897_v20 }
 0x757   :  { %v896_v22 = vpop.xlane.xlu1 %895 }
 0x758   :  { %1573 = vrsqrt.f32 %v899_v21  ;;  %v898_v23 = vmul.f32 0.0078125, %v896_v22 }
 0x75a   :  { %v900_v24 = vadd.f32 1e-12, %v898_v23 }
 0x75c   :  { %1575 = vrsqrt.f32 %v900_v24 }
 0x762   :  { %v1574_v25 = vpop.eup %1573 }
 0x763   :  { %v903_v26 = vmul.f32 %v1574_v25, %v889_v47 }
 0x765   :  { %v909_v29 = vmul.f32 %v1384_v27, %v903_v26 }
 0x766   :  { %v1576_v28 = vpop.eup %1575 }
 0x767   :  { %v904_v39 = vmul.f32 %v1576_v28, %v890_v51  ;;  %v2062_v32 = vadd.f32 %v1385_v30, %v909_v29 }
 0x769   :  { %v910_v31 = vmul.f32 %v1384_v27, %v904_v39 }
 0x76b   :  { %v2064_v33 = vadd.f32 %v1385_v30, %v910_v31 }
 0x76d   :  { %v919_v34 = vpack.c.bf16 %v2064_v33, %v2062_v32 }
 0x76f   :  { %977 = vmatmul.mubr.bf16.vlgmr.msra.gmra.mrb[8].mxu1 %v919_v34 }
 0x842   :  { %v978_v37 = vpop.f32.mrb[8].mxu1 }
 0x843   :  { %v979_v38 = vadd.f32 %v1386_v35, %v978_v37  ;;  %v980_v40 = vpop.f32.mrb[9].mxu1 }
 0x844   :  { %v981_v41 = vadd.f32 %v1387_v36, %v980_v40  ;;  %v982_v42 = vpop.f32.mrb[10].mxu1 }
 0x845   :  { %v987_v43 = vmul.f32 %v979_v38, %v979_v38  ;;  %v983_v44 = vadd.f32 %v1386_v35, %v982_v42  ;;  %v984_v45 = vpop.f32.mrb[11].mxu1 }
 0x846   :  { %v988_v46 = vmul.f32 %v981_v41, %v981_v41  ;;  %v985_v47 = vadd.f32 %v1387_v36, %v984_v45 }
 0x847   :  { %v991_v48 = vmul.f32 %v987_v43, %v979_v38  ;;  %v989_v49 = vmul.f32 %v983_v44, %v983_v44 }
 0x848   :  { %v992_v50 = vmul.f32 %v988_v46, %v981_v41  ;;  %v990_v51 = vmul.f32 %v985_v47, %v985_v47 }
 0x849   :  { %v995_v11 = vmul.f32 0.044715, %v991_v48  ;;  %v993_v52 = vmul.f32 %v989_v49, %v983_v44 }
 0x84a   :  { %v996_v12 = vmul.f32 0.044715, %v992_v50  ;;  %v994_v53 = vmul.f32 %v990_v51, %v985_v47 }
 0x84b   :  { %v999_v54 = vadd.f32 %v995_v11, %v979_v38  ;;  %v997_v55 = vmul.f32 0.044715, %v993_v52 }
 0x84c   :  { %v1000_v56 = vadd.f32 %v996_v12, %v981_v41  ;;  %v998_v9 = vmul.f32 0.044715, %v994_v53 }
 0x84d   :  { %v1003_v10 = vmul.f32 0.7978846, %v999_v54  ;;  %v1001_v14 = vadd.f32 %v997_v55, %v983_v44 }
 0x84e   :  { %v1004_v15 = vmul.f32 0.7978846, %v1000_v56  ;;  %v1002_v16 = vadd.f32 %v998_v9, %v985_v47 }
 0x84f   :  { %1577 = vtanh.f32 %v1003_v10  ;;  %v1005_v17 = vmul.f32 0.7978846, %v1001_v14 }
 0x850   :  { %1579 = vtanh.f32 %v1004_v15  ;;  %v1006_v18 = vmul.f32 0.7978846, %v1002_v16 }
 0x851   :  { %1581 = vtanh.f32 %v1005_v17 }
 0x852   :  { %1583 = vtanh.f32 %v1006_v18 }
 0x859   :  { %v1578_v19 = vpop.eup %1577 }
 0x85a   :  { %v1580_v20 = vpop.eup %1579  ;;  %v1011_v21 = vadd.f32 1.0, %v1578_v19 }
 0x85b   :  { %v1582_v22 = vpop.eup %1581  ;;  %v1012_v23 = vadd.f32 1.0, %v1580_v20 }
 0x85c   :  { %v1584_v24 = vpop.eup %1583  ;;  %v1015_v25 = vmul.f32 0.5, %v1011_v21  ;;  %v1013_v26 = vadd.f32 1.0, %v1582_v22 }
 0x85d   :  { %v1016_v27 = vmul.f32 0.5, %v1012_v23  ;;  %v1014_v28 = vadd.f32 1.0, %v1584_v24 }
 0x85e   :  { %v1019_v39 = vmul.f32 %v1015_v25, %v979_v38  ;;  %v1017_v29 = vmul.f32 0.5, %v1013_v26 }
 0x85f   :  { %v1020_v30 = vmul.f32 %v1016_v27, %v981_v41  ;;  %v1018_v31 = vmul.f32 0.5, %v1014_v28 }
 0x860   :  { %v1021_v34 = vmul.f32 %v1017_v29, %v983_v44 }
 0x861   :  { %v1022_v35 = vmul.f32 %v1018_v31, %v985_v47 }
 0x863   :  { %v1028_v36 = vpack.c.bf16 %v1022_v35, %v1020_v30 }
 0x864   :  { %1609 = dma.done.wait [#allocation4 + $0x1], 2048 }
 0x865   :  { %1610 = vsyncadd [#allocation4 + $0x1], 4294965248  ;;  %1499 = vmatprep.subr.bf16.mxu1 %v1611_v13  ;;  %1417 = vmatpush3.bf16.msra.mxu0 %v1826_v57  ;;  %v1027_v57 = vpack.c.bf16 %v1021_v34, %v1019_v39  ;;  %v1133_v43 = vld [vmem:[#allocation2 + $0x78] sm:$0xff]  ;;  %v2108_v48 = vld [vmem:[%s2188_s0 + $0x8] sm:$0xff]  ;;  %v1614_v50 = vmov 17   ;;  %v1615_v53 = vmov 18   ;;  %v1188_v26 = vlaneseq }
 0x866   :  { %1515 = vmatprep.mubr.msk.bf16.mxu1 %vm1613_vm0, %v1611_v13  ;;  %1418 = vmatprep.subr.bf16.mxu0 %v1871_v2  ;;  %v1134_v44 = vld [vmem:[#allocation2 + $0x98] sm:$0xff]  ;;  %v2113_v49 = vld [vmem:[%s2188_s0] sm:$0xff]  ;;  %v1521_v51 = vtrunc.f32 %v2108_v48  ;;  %v1389_v17 = vld [vmem:[%s2191_s3 + $0xc] ss:$0 sm:$0xff]  ;;  %vm1275_vm10 = vcmask 138368  }
 0x867   :  { %1082 = vmatprep.mubr.bf16.mxu0 %v1028_v36  ;;  %v1135_v45 = vld [vmem:[#allocation2 + $0xb8] sm:$0xff]  ;;  %1586 = vset.pattern.permute.xlu1 %v1614_v50  ;;  %v1519_v11 = vtrunc.f32 %v2113_v49  ;;  %v1390_v21 = vld [vmem:[%s2191_s3 + $0xd] ss:$0 sm:$0xff]  ;;  %v2124_v27 = vand.u32 127, %v1188_v26  ;;  %v1391_v28 = vld [vmem:[%s2191_s3 + $0x7] ss:$0 sm:$0xff] }
 0x868   :  { %v1136_v46 = vld [vmem:[#allocation2 + $0xd8] sm:$0xff]  ;;  %1585 = vset.pattern.permute.xlu0 %v1614_v50 }
 0x869   :  { %1419 = vmatpush3.bf16.msra.mxu0 %v1831_v58  ;;  %v1137_v47 = vld [vmem:[#allocation2 + $0xf8] sm:$0xff]  ;;  %v1520_v52 = vcvt.f32.s32 %v1519_v11  ;;  %vm1193_vm2 = vcmp.lt.s32.totalorder %v2124_v27, 8  ;;  %vm1194_vm3 = vcmp.ge.s32.totalorder %v2124_v27, 8  ;;  %vm1195_vm4 = vcmp.lt.s32.totalorder %v2124_v27, 24 }
 0x86a   :  { %1420 = vmatprep.subr.bf16.mxu0 %v1876_v3  ;;  %vm2139_vm5 = vmand %vm1194_vm3, %vm1195_vm4  ;;  %vm1302_vm12 = vcmp.eq.s32.totalorder %v2124_v27, 127 }
 0x86b   :  { %v1253_v12 = vadd.s32 8, %v1520_v52 }
 0x86d   :  { %1421 = vmatpush3.bf16.msra.mxu0 %v1836_v59 }
 0x86e   :  { %1422 = vmatprep.subr.bf16.mxu0 %v1881_v4 }
 0x871   :  { %1423 = vmatpush3.bf16.msra.mxu0 %v1841_v60  ;;  %v1388_v60 = vld [vmem:[%s2191_s3 + $0x6] ss:$0 sm:$0xff] }
 0x872   :  { %1424 = vmatprep.subr.bf16.mxu0 %v1886_v5 }
 0x875   :  { %1425 = vmatpush3.bf16.msra.mxu0 %v1846_v61 }
 0x876   :  { %1426 = vmatprep.subr.bf16.mxu0 %v1891_v6 }
 0x879   :  { %1427 = vmatpush3.bf16.msra.mxu0 %v1851_v62 }
 0x87a   :  { %1428 = vmatprep.subr.bf16.mxu0 %v1896_v7 }
 0x87d   :  { %1429 = vmatpush3.bf16.msra.mxu0 %v1856_v63 }
 0x87e   :  { %1430 = vmatprep.subr.bf16.mxu0 %v1901_v8 }
 0x881   :  { %1431 = vmatpush3.bf16.msra.mxu0 %v1861_v0  ;;  %v1130_v0 = vld [vmem:[#allocation2 + $0x18] sm:$0xff] }
 0x882   :  { %1500 = vmatpush3.bf16.msra.mxu1 %v1130_v0 }
 0x883   :  { %1501 = vmatprep.subr.bf16.mxu1 %v1611_v13 }
 0x884   :  { %1083 = vmatmul.mubr.bf16.vlgmr.msra.gmra.mrb[12].mxu0 %v1027_v57 }
 0x957   :  { %v1432_v58 = vpop.f32.mrb[12].mxu0 }
 0x958   :  { %v1433_v59 = vpop.f32.mrb[13].mxu0 }
 0x959   :  { %v1434_v61 = vadd.f32 %v1433_v59, %v1432_v58  ;;  %v1435_v1 = vpop.f32.mrb[14].mxu0 }
 0x95a   :  { %v1436_v2 = vpop.f32.mrb[15].mxu0 }
 0x95b   :  { %v1437_v62 = vadd.f32 %v1436_v2, %v1435_v1  ;;  %v1085_v3 = vadd.f32 %v1434_v61, %v1388_v60 }
 0x95d   :  { %v1091_v4 = vadd.f32 %v1085_v3, %v2062_v32  ;;  %v1088_v63 = vadd.f32 %v1437_v62, %v1388_v60  ;;  %v1131_v32 = vld [vmem:[#allocation2 + $0x38] sm:$0xff] }
 0x95e   :  { %1502 = vmatpush3.bf16.msra.mxu1 %v1131_v32 }
 0x95f   :  { %1095 = vadd.xlane.f32.xlu0 %v1091_v4  ;;  %v1092_v5 = vadd.f32 %v1088_v63, %v2064_v33  ;;  %1503 = vmatprep.subr.bf16.mxu1 %v1611_v13  ;;  %v1132_v33 = vld [vmem:[#allocation2 + $0x58] sm:$0xff] }
 0x962   :  { %1504 = vmatpush3.bf16.msra.mxu1 %v1132_v33 }
 0x963   :  { %1097 = vadd.xlane.f32.xlu0 %v1092_v5  ;;  %1505 = vmatprep.subr.bf16.mxu1 %v1611_v13 }
 0x966   :  { %1506 = vmatpush3.bf16.msra.mxu1 %v1133_v43 }
 0x967   :  { %1507 = vmatprep.subr.bf16.mxu1 %v1611_v13 }
 0x96a   :  { %1508 = vmatpush3.bf16.msra.mxu1 %v1134_v44 }
 0x96b   :  { %1509 = vmatprep.subr.bf16.mxu1 %v1611_v13 }
 0x96e   :  { %1510 = vmatpush3.bf16.msra.mxu1 %v1135_v45 }
 0x96f   :  { %1511 = vmatprep.subr.bf16.mxu1 %v1611_v13 }
 0x972   :  { %1512 = vmatpush3.bf16.msra.mxu1 %v1136_v46 }
 0x973   :  { %1513 = vmatprep.subr.bf16.mxu1 %v1611_v13  ;;  %v1522_v13 = vcvt.f32.s32 %v1521_v51 }
 0x975   :  { %v1254_v61 = vadd.s32 8, %v1522_v13 }
 0x976   :  { %1514 = vmatpush3.bf16.msra.mxu1 %v1137_v47 }
 0x9ec   :  { %v1096_v6 = vpop.xlane.xlu0 %1095 }
 0x9ed   :  { %v1099_v7 = vmul.f32 0.0078125, %v1096_v6 }
 0x9ef   :  { %v1101_v8 = vsub.f32 %v1091_v4, %v1099_v7 }
 0x9f0   :  { %v1098_v37 = vpop.xlane.xlu0 %1097 }
 0x9f1   :  { %v1100_v38 = vmul.f32 0.0078125, %v1098_v37  ;;  %v1103_v40 = vmul.f32 %v1101_v8, %v1101_v8 }
 0x9f3   :  { %v1102_v41 = vsub.f32 %v1092_v5, %v1100_v38  ;;  %1105 = vadd.xlane.f32.xlu1 %v1103_v40 }
 0x9f5   :  { %v1104_v42 = vmul.f32 %v1102_v41, %v1102_v41 }
 0x9f7   :  { %1107 = vadd.xlane.f32.xlu1 %v1104_v42 }
 0xa08   :  { %1243 = vperm.xlu1 %1586, %v1522_v13   ;;  %v1616_v13 = vmov 16  }
 0xa0c   :  { %1587 = vset.pattern.permute.xlu1 %v1615_v53 }
 0xa0d   :  { %1256 = vperm.xlu1 %1587, %v1253_v12   ;;  %v1276_v12 = vsel %vm1275_vm10, %v2113_v49, 0.0 }
 0xa80   :  { %v1106_v54 = vpop.xlane.xlu1 %1105 }
 0xa81   :  { %v1109_v55 = vmul.f32 0.0078125, %v1106_v54 }
 0xa83   :  { %v1111_v56 = vadd.f32 1e-12, %v1109_v55 }
 0xa84   :  { %v1108_v9 = vpop.xlane.xlu1 %1107 }
 0xa85   :  { %1589 = vrsqrt.f32 %v1111_v56  ;;  %v1110_v10 = vmul.f32 0.0078125, %v1108_v9 }
 0xa87   :  { %v1112_v14 = vadd.f32 1e-12, %v1110_v10 }
 0xa88   :  { %v1244_v1 = vpop.permute.xlu1 %1243 }
 0xa89   :  { %1591 = vrsqrt.f32 %v1112_v14  ;;  %vm1246_vm8 = vcmp.eq.s32.totalorder %v2124_v27, %v1244_v1 }
 0xa8c   :  { %v1257_v2 = vpop.permute.xlu1 %1256 }
 0xa8d   :  { %vm1261_vm6 = vcmp.eq.s32.totalorder %v2124_v27, %v1257_v2 }
 0xa8f   :  { %v1590_v15 = vpop.eup %1589 }
 0xa90   :  { %v1115_v16 = vmul.f32 %v1590_v15, %v1101_v8 }
 0xa92   :  { %v1121_v20 = vmul.f32 %v1389_v17, %v1115_v16 }
 0xa93   :  { %v1592_v18 = vpop.eup %1591 }
 0xa94   :  { %v1116_v19 = vmul.f32 %v1592_v18, %v1102_v41  ;;  %v1127_v23 = vadd.f32 %v1390_v21, %v1121_v20 }
 0xa96   :  { %v1122_v22 = vmul.f32 %v1389_v17, %v1116_v19 }
 0xa98   :  { %v1128_v24 = vadd.f32 %v1390_v21, %v1122_v22 }
 0xa9a   :  { %v1129_v25 = vpack.c.bf16 %v1128_v24, %v1127_v23 }
 0xa9c   :  { %1516 = vmatmul.mubr.bf16.vlgmr.msra.gmra.mrb[12].mxu1 %v1129_v25 }
 0xb6f   :  { %v1177_v39 = vpop.f32.mrb[12].mxu1 }
 0xb70   :  { %v2130_v29 = vadd.f32 %v1391_v28, %v1177_v39  ;;  %v1517_v30 = vpop.f32.mrb[13].mxu1 }
 0xb71   :  { %v1180_v31 = vpop.f32.mrb[14].mxu1 }
 0xb72   :  { %v1181_v34 = vadd.f32 %v1391_v28, %v1180_v31  ;;  %v1518_v35 = vpop.f32.mrb[15].mxu1  ;;  %v1197_v36 = vsel %vm1193_vm2, %v2130_v29, -1e+30  ;;  %v1203_v59 = vsel %vm2139_vm5, %v2130_v29, -1e+30 }
 0xb73   :  { %1199 = vmax.xlane.f32.xlu0 %v1197_v36 }
 0xb74   :  { %1313 = vst [vmem:[%s2194_s6 + $0x8] sm:$0xff] %v1181_v34  ;;  %v1198_v58 = vsel %vm1193_vm2, %v1181_v34, -1e+30  ;;  %v1204_v60 = vsel %vm2139_vm5, %v1181_v34, -1e+30 }
 0xb75   :  { %1201 = vmax.xlane.f32.xlu1 %v1198_v58 }
 0xb77   :  { %1205 = vmax.xlane.f32.xlu0 %v1203_v59 }
 0xb79   :  { %1207 = vmax.xlane.f32.xlu1 %v1204_v60 }
 0xb8a   :  { %1259 = vperm.xlu1 %1587, %v1254_v61  }
 0xb8d   :  { %1240 = vperm.xlu0 %1585, %v1520_v52   ;;  %v1277_v52 = vsel %vm1275_vm10, %v2108_v48, 0.0 }
 0xb8e   :  { %v1278_v53 = vadd.f32 %v1277_v52, %v1276_v12 }
 0xb90   :  { %v1279_v54 = vrot.slane %v1278_v53, 4 }
 0xb91   :  { %1588 = vset.pattern.permute.xlu0 %v1616_v13 }
 0xb92   :  { %v1280_v9 = vadd.f32 %v1279_v54, %v1278_v53 }
 0xb94   :  { %v1281_v14 = vrot.slane %v1280_v9, 2 }
 0xb96   :  { %v1282_v16 = vadd.f32 %v1281_v14, %v1280_v9 }
 0xb98   :  { %v1283_v21 = vrot.slane %v1282_v16, 1 }
 0xb9a   :  { %v1284_v31 = vadd.f32 %v1283_v21, %v1282_v16 }
 0xb9c   :  { %v1285_v60 = vmax.f32 %v1284_v31, 1.0 }
 0xc00   :  { %v1200_v62 = vpop.xlane.xlu0 %1199 }
 0xc02   :  { %v1202_v3 = vpop.xlane.xlu1 %1201 }
 0xc04   :  { %v1206_v4 = vpop.xlane.xlu0 %1205 }
 0xc05   :  { %v1209_v63 = vsel %vm1193_vm2, %v1200_v62, %v1206_v4 }
 0xc06   :  { %v1211_v5 = vsub.f32 %v2130_v29, %v1209_v63  ;;  %v1208_v0 = vpop.xlane.xlu1 %1207 }
 0xc07   :  { %v1210_v6 = vsel %vm1193_vm2, %v1202_v3, %v1208_v0 }
 0xc08   :  { %v1213_v7 = vsel %vm1195_vm4, %v1211_v5, -1e+30  ;;  %v1212_v8 = vsub.f32 %v1181_v34, %v1210_v6 }
 0xc09   :  { %v1215_v37 = vmul.f32 1.442695, %v1213_v7  ;;  %v1263_v45 = vsel %vm1261_vm6, %v1213_v7, 0.0 }
 0xc0a   :  { %v1214_v38 = vsel %vm1195_vm4, %v1212_v8, -1e+30  ;;  %v1260_v50 = vpop.permute.xlu1 %1259 }
 0xc0b   :  { %1593 = vpow2.f32 %v1215_v37  ;;  %v1217_v40 = vmul.f32 1.442695, %v1214_v38  ;;  %v1248_v51 = vsel %vm1246_vm8, %v1214_v38, 0.0  ;;  %vm1262_vm9 = vcmp.eq.s32.totalorder %v2124_v27, %v1260_v50 }
 0xc0c   :  { %v1241_v44 = vpop.permute.xlu0 %1240  ;;  %v1264_v11 = vsel %vm1262_vm9, %v1214_v38, 0.0 }
 0xc0d   :  { %1595 = vpow2.f32 %v1217_v40  ;;  %vm1245_vm7 = vcmp.eq.s32.totalorder %v2124_v27, %v1241_v44 }
 0xc0e   :  { %v1247_v47 = vsel %vm1245_vm7, %v1213_v7, 0.0 }
 0xc15   :  { %v1594_v41 = vpop.eup %1593 }
 0xc16   :  { %v1219_v42 = vsel %vm1193_vm2, %v1594_v41, 0.0  ;;  %v1229_v43 = vsel %vm2139_vm5, %v1594_v41, 0.0 }
 0xc17   :  { %v1596_v32 = vpop.eup %1595  ;;  %1221 = vadd.xlane.f32.xlu1 %v1219_v42 }
 0xc18   :  { %v1220_v33 = vsel %vm1193_vm2, %v1596_v32, 0.0  ;;  %v1230_v46 = vsel %vm2139_vm5, %v1596_v32, 0.0 }
 0xc19   :  { %1223 = vadd.xlane.f32.xlu0 %v1220_v33 }
 0xc1b   :  { %1231 = vadd.xlane.f32.xlu1 %v1229_v43 }
 0xc1d   :  { %1265 = vadd.xlane.f32.xlu0 %v1263_v45 }
 0xc1f   :  { %1233 = vadd.xlane.f32.xlu1 %v1230_v46 }
 0xc23   :  { %1249 = vadd.xlane.f32.xlu1 %v1247_v47 }
 0xc27   :  { %1251 = vadd.xlane.f32.xlu1 %v1248_v51 }
 0xc2b   :  { %1267 = vadd.xlane.f32.xlu1 %v1264_v11 }
 0xca4   :  { %v1222_v55 = vpop.xlane.xlu1 %1221 }
 0xca5   :  { %1597 = vlog2.f32 %v1222_v55 }
 0xca6   :  { %v1224_v56 = vpop.xlane.xlu0 %1223 }
 0xca7   :  { %1599 = vlog2.f32 %v1224_v56 }
 0xca8   :  { %v1232_v10 = vpop.xlane.xlu1 %1231 }
 0xca9   :  { %1601 = vlog2.f32 %v1232_v10 }
 0xcaa   :  { %v1266_v25 = vpop.xlane.xlu0 %1265 }
 0xcac   :  { %v1234_v15 = vpop.xlane.xlu1 %1233 }
 0xcad   :  { %1603 = vlog2.f32 %v1234_v15 }
 0xcae   :  { %1605 = vrcp.f32 %v1285_v60 }
 0xcaf   :  { %v1598_v17 = vpop.eup %1597 }
 0xcb0   :  { %v1250_v18 = vpop.xlane.xlu1 %1249  ;;  %v1226_v20 = vmul.f32 0.6931472, %v1598_v17 }
 0xcb1   :  { %v1600_v19 = vpop.eup %1599 }
 0xcb2   :  { %v1269_v39 = vsub.f32 %v1226_v20, %v1250_v18  ;;  %v1228_v30 = vmul.f32 0.6931472, %v1600_v19 }
 0xcb3   :  { %v1602_v22 = vpop.eup %1601 }
 0xcb4   :  { %v1236_v23 = vmul.f32 0.6931472, %v1602_v22  ;;  %v1252_v24 = vpop.xlane.xlu1 %1251 }
 0xcb5   :  { %v1270_v58 = vsub.f32 %v1228_v30, %v1252_v24 }
 0xcb6   :  { %v1271_v28 = vsub.f32 %v1236_v23, %v1266_v25 }
 0xcb7   :  { %v1604_v34 = vpop.eup %1603 }
 0xcb8   :  { %v1273_v35 = vadd.f32 %v1271_v28, %v1269_v39  ;;  %v1238_v36 = vmul.f32 0.6931472, %v1604_v34  ;;  %v1268_v57 = vpop.xlane.xlu1 %1267  ;;  %v1606_v6 = vpop.eup %1605 }
 0xcb9   :  { %v1298_v37 = vmul.f32 0.5, %v1606_v6 }
 0xcba   :  { %v1272_v59 = vsub.f32 %v1238_v36, %v1268_v57  ;;  %v1286_v61 = vmul.f32 %v1273_v35, %v2113_v49  ;;  %v1191_v49 = vshrl.u32 %v1188_v26, 7 }
 0xcbc   :  { %v1274_v1 = vadd.f32 %v1272_v59, %v1270_v58  ;;  %v1288_v62 = vsel %vm1275_vm10, %v1286_v61, 0.0  ;;  %vm1300_vm11 = vcmp.eq.s32.totalorder %v1191_v49, 0 }
 0xcbd   :  { %vm1303_vm13 = vmand %vm1300_vm11, %vm1302_vm12 }
 0xcbe   :  { %v1287_v2 = vmul.f32 %v1274_v1, %v2108_v48 }
 0xcc0   :  { %v1289_v3 = vsel %vm1275_vm10, %v1287_v2, 0.0 }
 0xcc1   :  { %v1290_v4 = vadd.f32 %v1289_v3, %v1288_v62 }
 0xcc3   :  { %v1291_v63 = vrot.slane %v1290_v4, 4 }
 0xcc5   :  { %v1292_v5 = vadd.f32 %v1291_v63, %v1290_v4 }
 0xcc7   :  { %v1293_v0 = vrot.slane %v1292_v5, 2 }
 0xcc9   :  { %v1294_v7 = vadd.f32 %v1293_v0, %v1292_v5 }
 0xccb   :  { %v1295_v8 = vrot.slane %v1294_v7, 1 }
 0xccd   :  { %v1296_v38 = vadd.f32 %v1295_v8, %v1294_v7 }
 0xccf   :  { %v1299_v40 = vmul.f32 %v1298_v37, %v1296_v38 }
 0xcd1   :  { %1307 = vperm.xlu0 %1588, %v1299_v40  }
 0xd50   :  { %v1308_v48 = vpop.permute.xlu0 %1307 }
 0xd51   :  { %v1310_v41 = vsel %vm1303_vm13, %v1308_v48, %v2130_v29 }
 0xd52   :  { %1312 = vst [vmem:[%s2194_s6] sm:$0xff] %v1310_v41 }
 0xd53   :  { %1318 = vsyncmov [#allocation4] }
 0xd56   :  { %s1319_s28 = vpop.sfrf %1318 }
 0xd57   :  { %p1392_p0 = scmp.ne.s32.totalorder %s1319_s28, 0 }
 0xd59   :  { %1323 = shalt.err (%p1392_p0)  }
 0xd5a   :  { %1325 = vsyncmov [#allocation4 + $0x1] }
 0xd5d   :  { %s1326_s5 = vpop.sfrf %1325 }
 0xd5e   :  { %p1393_p1 = scmp.ne.s32.totalorder %s1326_s5, 0 }
 0xd60   :  { %1330 = shalt.err (%p1393_p1)  }

</bundles_post_ra>
